<compile_context>
chip_gen: v5e
topology: v5e:2x2
jax: 0.10.0
libtpu: 0.0.40
codegen_flags: <defaults>
</compile_context>

<pallas_src>
import jax
import jax.numpy as jnp
from jax.experimental import pallas as pl
from jax.experimental.pallas import tpu as pltpu


def _mlp_kernel(x_ref, w1_ref, b1_ref, w2_ref, b2_ref, w3_ref, b3_ref, o_ref):
    # x tile streamed in its native dtype (f32 or bf16); cast to bf16 on the
    # VPU right before the MXU (hidden under the matmul).
    x = x_ref[...].astype(jnp.bfloat16)
    h1 = jnp.dot(x, w1_ref[...], preferred_element_type=jnp.float32)
    # Fused bias + ReLU + bf16 downcast (shortens the f32 intermediate's life).
    h1 = jnp.maximum(h1 + b1_ref[...], 0.0).astype(jnp.bfloat16)
    # Dropout(p=0.2) -> identity in eval mode.
    h2 = jnp.dot(h1, w2_ref[...], preferred_element_type=jnp.float32)
    h2 = jnp.maximum(h2 + b2_ref[...], 0.0).astype(jnp.bfloat16)
    # Dropout(p=0.2) -> identity in eval mode.
    # Final 64->1 layer as a trans-B contraction so the stored block is a
    # lane-dense (1, TB) row rather than a masked (TB, 1) column.
    # TODO(synk): if an MLIR dump ever shows an explicit vxpose of h2 here,
    # switch to elementwise h2 * w3_row + a single lane reduction.
    logits = jax.lax.dot_general(
        w3_ref[...], h2,
        dimension_numbers=(((1,), (1,)), ((), ())),
        preferred_element_type=jnp.float32)                 # (1, TB)
    logits = logits + b3_ref[0, 0]
    o_ref[...] = jax.nn.sigmoid(logits).astype(o_ref.dtype)


def _round_up(n, m):
    return ((n + m - 1) // m) * m


def _tpu_vmem_capacity_bytes():
    """Best-effort query of per-core VMEM capacity; conservative fallback."""
    try:
        info = pltpu.get_tpu_info()
        cap = getattr(info, "vmem_capacity_bytes", None)
        if cap:
            return int(cap)
    except Exception:
        pass
    return 64 << 20   # v7x per-TensorCore VMEM (safe lower bound everywhere)


def _choose_tile(batch, tile_cap):
    """Batch tile: as large as allowed (multiple of 512), but guarantee >=2
    grid steps once the batch is big enough so the ("parallel",) grid axis can
    shard across v7x's two TensorCores."""
    tile_cap = max(512, _round_up(int(tile_cap), 512))
    tile = min(tile_cap, max(512, _round_up(batch, 512)))
    if batch <= tile and _round_up(batch, 512) >= 1024:
        tile = max(512, _round_up(pl.cdiv(batch, 2), 512))
    return tile


def prepare_params(params, *, dlen=256):
    """One-time weight prep (hoisted out of the per-call path): zero-pad
    feature dims to lane-full multiples of 128 and cast matmul operands to
    bf16. Zero padding is exact: padded columns see ReLU(0 + 0) = 0 and
    contribute nothing downstream."""
    if isinstance(params, dict) and params.get("prepared", False):
        return params
    w1, b1 = params["w1"], params["b1"]
    w2, b2 = params["w2"], params["b2"]
    w3, b3 = params["w3"], params["b3"]
    inode, onode = w1.shape
    hid = w2.shape[1]
    assert w2.shape[0] == onode and w3.shape == (hid, 1) and b3.shape == (1,)

    d_in = _round_up(inode, 128)
    d_mid = _round_up(onode, 128)
    d_hid = _round_up(hid, 128)

    return {
        "prepared": True,
        "dlen": dlen,
        "inode": inode,
        "d_in": d_in,
        "d_mid": d_mid,
        "d_hid": d_hid,
        "w1": jnp.pad(w1, ((0, d_in - inode), (0, d_mid - onode))).astype(jnp.bfloat16),
        "b1": jnp.pad(b1, (0, d_mid - onode)).reshape(1, d_mid).astype(jnp.float32),
        "w2": jnp.pad(w2, ((0, d_mid - onode), (0, d_hid - hid))).astype(jnp.bfloat16),
        "b2": jnp.pad(b2, (0, d_hid - hid)).reshape(1, d_hid).astype(jnp.float32),
        "w3_row": jnp.pad(w3.reshape(1, hid),
                          ((0, 0), (0, d_hid - hid))).astype(jnp.bfloat16),
        "b3": b3.reshape(1, 1).astype(jnp.float32),
    }


def regnetv2_forward(x, params, *, dlen=256, tile_b=None):
    """Forward pass of RegNetv2.

    x: [B, 256] float32 (or bfloat16 if the producer already emits bf16).
    params: raw dict (w1,b1,w2,b2,w3,b3; weights stored [in, out]) or the
            output of prepare_params().
    """
    p = params if (isinstance(params, dict) and params.get("prepared", False)) \
        else prepare_params(params, dlen=dlen)

    # Feature-selection branch (plain JAX glue, matches the PyTorch module).
    if dlen > 128:
        feat = x
    else:
        step = int(256 / dlen)
        feat = x[:, 0:-1:step]

    B, inode = feat.shape
    assert inode == p["inode"]
    d_in, d_mid, d_hid = p["d_in"], p["d_mid"], p["d_hid"]

    # Only pad the feature dim if it is not already lane-full (never the case
    # for dlen=256). The batch dim is NOT padded: partial edge blocks are
    # handled by Pallas (masked output stores; garbage rows never written).
    if d_in != inode:
        feat = jnp.pad(feat, ((0, 0), (0, d_in - inode)))
    x_bytes = feat.dtype.itemsize

    vmem_cap = _tpu_vmem_capacity_bytes()
    if tile_b is None:
        # 16384 fits v5e/v6e's 128 MiB VMEM; cap at 8192 on v7x (64 MiB).
        tile_b = 16384 if vmem_cap >= (100 << 20) else 8192
    tile = _choose_tile(B, tile_b)
    grid = (pl.cdiv(B, tile),)

    # Scoped-VMEM budget sized to the tile (defaults of 16/32 MiB are too
    # small for 8K-row tiles even though physical VMEM is plentiful).
    vmem_est = (2 * tile * d_in * x_bytes          # double-buffered x tile
                + tile * d_mid * 6                 # h1 f32 + bf16
                + tile * d_hid * 6                 # h2 f32 + bf16
                + 2 * tile * 4                     # output row (dbl-buffered)
                + (d_in * d_mid + d_mid * d_hid + d_hid) * 2
                + (d_mid + d_hid + 1) * 4)
    vmem_limit = int(max(32 << 20, min(vmem_est + (16 << 20),
                                       int(vmem_cap * 0.85))))

    flops = 2 * B * (d_in * d_mid + d_mid * d_hid + d_hid)
    bytes_accessed = (B * d_in * x_bytes + B * 4
                      + (d_in * d_mid + d_mid * d_hid + d_hid) * 2
                      + (d_mid + d_hid + 1) * 4)

    out_row = pl.pallas_call(
        _mlp_kernel,
        out_shape=jax.ShapeDtypeStruct((1, B), jnp.float32),
        grid_spec=pltpu.PrefetchScalarGridSpec(
            num_scalar_prefetch=0,
            grid=grid,
            in_specs=[
                pl.BlockSpec((tile, d_in), lambda i: (i, 0)),     # x tile (streamed)
                pl.BlockSpec((d_in, d_mid), lambda i: (0, 0)),    # W1 (resident)
                pl.BlockSpec((1, d_mid), lambda i: (0, 0)),       # b1
                pl.BlockSpec((d_mid, d_hid), lambda i: (0, 0)),   # W2
                pl.BlockSpec((1, d_hid), lambda i: (0, 0)),       # b2
                pl.BlockSpec((1, d_hid), lambda i: (0, 0)),       # W3 as a row
                pl.BlockSpec(memory_space=pltpu.MemorySpace.SMEM),  # b3 scalar
            ],
            out_specs=pl.BlockSpec((1, tile), lambda i: (0, i)),  # lane-dense
        ),
        compiler_params=pltpu.CompilerParams(
            dimension_semantics=("parallel",),
            vmem_limit_bytes=vmem_limit,
        ),
        cost_estimate=pl.CostEstimate(
            flops=int(flops), transcendentals=int(B),
            bytes_accessed=int(bytes_accessed)),
    )(feat, p["w1"], p["b1"], p["w2"], p["b2"], p["w3_row"], p["b3"])

    # (1, B) lane-dense row -> (B, 1) column (row-major order identical: free).
    return out_row.reshape(B, 1)


def init_params(key, dlen=256):
    """Deterministic parameter init mirroring _initialize_weights semantics
    for Linear layers: weight ~ N(0, 0.01), bias = 0."""
    if dlen > 128:
        inode, onode = 256, dlen
    else:
        inode, onode = dlen, 128
    k1, k2, k3 = jax.random.split(key, 3)
    return {
        "w1": 0.01 * jax.random.normal(k1, (inode, onode), jnp.float32),
        "b1": jnp.zeros((onode,), jnp.float32),
        "w2": 0.01 * jax.random.normal(k2, (onode, 64), jnp.float32),
        "b2": jnp.zeros((64,), jnp.float32),
        "w3": 0.01 * jax.random.normal(k3, (64, 1), jnp.float32),
        "b3": jnp.zeros((1,), jnp.float32),
    }


def _reference_forward(x, params, dlen=256):
    """Pure-JAX f32 reference for correctness checking."""
    if dlen > 128:
        feat = x
    else:
        step = int(256 / dlen)
        feat = x[:, 0:-1:step]
    h1 = jnp.maximum(feat @ params["w1"] + params["b1"], 0.0)
    h2 = jnp.maximum(h1 @ params["w2"] + params["b2"], 0.0)
    return jax.nn.sigmoid(h2 @ params["w3"] + params["b3"])


if __name__ == "__main__":
    key = jax.random.PRNGKey(0)
    kx, kp = jax.random.split(key)

    dlen = 256
    params = init_params(kp, dlen=dlen)
    prepped = prepare_params(params, dlen=dlen)   # one-time weight prep

    # B=300: single partial block, 1-step grid.
    # B=640: 2-step grid ("parallel" axis / megacore path) with a partial
    #        final block; no batch padding in either case.
    for B in (300, 640):
        x = jax.random.normal(jax.random.fold_in(kx, B), (B, 256), jnp.float32)
        out = jax.block_until_ready(regnetv2_forward(x, prepped, dlen=dlen))
        ref = _reference_forward(x, params, dlen=dlen)
        assert out.shape == (B, 1)
        max_diff = float(jnp.max(jnp.abs(out - ref)))
        # bf16 matmul inputs (f32 accumulation) -> loosened tolerance vs f32.
        assert jnp.allclose(out, ref, atol=5e-3, rtol=5e-3), (
            f"B={B}: mismatch vs reference, max abs diff {max_diff}")

    print("KERNEL_OK")
</pallas_src>

<mosaic_0001>
module attributes {stable_mosaic.version = 11 : i64} {
  func.func @_mlp_kernel(%arg0: i32, %arg1: memref<512x256xf32, #tpu.memory_space<vmem>>, %arg2: memref<256x256xbf16, #tpu.memory_space<vmem>>, %arg3: memref<1x256xf32, #tpu.memory_space<vmem>>, %arg4: memref<256x128xbf16, #tpu.memory_space<vmem>>, %arg5: memref<1x128xf32, #tpu.memory_space<vmem>>, %arg6: memref<1x128xbf16, #tpu.memory_space<vmem>>, %arg7: memref<1x1xf32, #tpu.memory_space<smem>>, %arg8: memref<1x512xf32, #tpu.memory_space<vmem>>) attributes {dimension_semantics = [#tpu.dimension_semantics<parallel>], iteration_bounds = array<i64: 1>, scalar_prefetch = 0 : i64, scratch_operands = 0 : i64, tpu.core_type = #tpu.core_type<tc>, window_params = [{transform_indices = @transform_0, window_bounds = array<i64: 512, 256>}, {pipeline_mode = #tpu.pipeline_mode<synchronous>, transform_indices = @transform_1, window_bounds = array<i64: 256, 256>}, {pipeline_mode = #tpu.pipeline_mode<synchronous>, transform_indices = @transform_2, window_bounds = array<i64: 1, 256>}, {pipeline_mode = #tpu.pipeline_mode<synchronous>, transform_indices = @transform_3, window_bounds = array<i64: 256, 128>}, {pipeline_mode = #tpu.pipeline_mode<synchronous>, transform_indices = @transform_4, window_bounds = array<i64: 1, 128>}, {pipeline_mode = #tpu.pipeline_mode<synchronous>, transform_indices = @transform_5, window_bounds = array<i64: 1, 128>}, {transform_indices = @transform_6, window_bounds = array<i64: 1, 1>}, {transform_indices = @transform_7, window_bounds = array<i64: 1, 512>}]} {
    %c0 = arith.constant 0 : index
    %c0_0 = arith.constant 0 : index
    %0 = vector.load %arg1[%c0, %c0_0] : memref<512x256xf32, #tpu.memory_space<vmem>>, vector<512x256xf32>
    %1 = arith.truncf %0 : vector<512x256xf32> to vector<512x256xbf16>
    %c0_1 = arith.constant 0 : index
    %c0_2 = arith.constant 0 : index
    %2 = vector.load %arg2[%c0_1, %c0_2] : memref<256x256xbf16, #tpu.memory_space<vmem>>, vector<256x256xbf16>
    %cst = arith.constant dense<0.000000e+00> : vector<512x256xf32>
    %3 = tpu.matmul %1, %2, %cst {dimension_numbers = #tpu.dot_dimension_numbers<[1], [0], [0], [1], [0, 0, 1, 1], [], []>} : vector<512x256xbf16>, vector<256x256xbf16>, vector<512x256xf32> -> vector<512x256xf32>
    %c0_3 = arith.constant 0 : index
    %c0_4 = arith.constant 0 : index
    %4 = vector.load %arg3[%c0_3, %c0_4] : memref<1x256xf32, #tpu.memory_space<vmem>>, vector<1x256xf32>
    %5 = vector.broadcast %4 : vector<1x256xf32> to vector<512x256xf32>
    %6 = arith.addf %3, %5 : vector<512x256xf32>
    %cst_5 = arith.constant 0.000000e+00 : f32
    %7 = vector.broadcast %cst_5 : f32 to vector<512x256xf32>
    %8 = arith.maximumf %6, %7 : vector<512x256xf32>
    %9 = arith.truncf %8 : vector<512x256xf32> to vector<512x256xbf16>
    %c0_6 = arith.constant 0 : index
    %c0_7 = arith.constant 0 : index
    %10 = vector.load %arg4[%c0_6, %c0_7] : memref<256x128xbf16, #tpu.memory_space<vmem>>, vector<256x128xbf16>
    %cst_8 = arith.constant dense<0.000000e+00> : vector<512x128xf32>
    %11 = tpu.matmul %9, %10, %cst_8 {dimension_numbers = #tpu.dot_dimension_numbers<[1], [0], [0], [1], [0, 0, 1, 1], [], []>} : vector<512x256xbf16>, vector<256x128xbf16>, vector<512x128xf32> -> vector<512x128xf32>
    %c0_9 = arith.constant 0 : index
    %c0_10 = arith.constant 0 : index
    %12 = vector.load %arg5[%c0_9, %c0_10] : memref<1x128xf32, #tpu.memory_space<vmem>>, vector<1x128xf32>
    %13 = vector.broadcast %12 : vector<1x128xf32> to vector<512x128xf32>
    %14 = arith.addf %11, %13 : vector<512x128xf32>
    %cst_11 = arith.constant 0.000000e+00 : f32
    %15 = vector.broadcast %cst_11 : f32 to vector<512x128xf32>
    %16 = arith.maximumf %14, %15 : vector<512x128xf32>
    %17 = arith.truncf %16 : vector<512x128xf32> to vector<512x128xbf16>
    %c0_12 = arith.constant 0 : index
    %c0_13 = arith.constant 0 : index
    %18 = vector.load %arg6[%c0_12, %c0_13] : memref<1x128xbf16, #tpu.memory_space<vmem>>, vector<1x128xbf16>
    %cst_14 = arith.constant dense<0.000000e+00> : vector<1x512xf32>
    %19 = tpu.matmul %18, %17, %cst_14 {dimension_numbers = #tpu.dot_dimension_numbers<[1], [1], [0], [0], [0, 0, 1, 0], [], []>} : vector<1x128xbf16>, vector<512x128xbf16>, vector<1x512xf32> -> vector<1x512xf32>
    %c0_15 = arith.constant 0 : index
    %c0_16 = arith.constant 0 : index
    %20 = memref.load %arg7[%c0_15, %c0_16] : memref<1x1xf32, #tpu.memory_space<smem>>
    %21 = vector.broadcast %20 : f32 to vector<1x512xf32>
    %22 = arith.addf %19, %21 : vector<1x512xf32>
    %23 = arith.negf %22 : vector<1x512xf32>
    %24 = math.exp %23 : vector<1x512xf32>
    %cst_17 = arith.constant 1.000000e+00 : f32
    %25 = vector.broadcast %cst_17 : f32 to vector<1x512xf32>
    %26 = arith.addf %25, %24 : vector<1x512xf32>
    %27 = arith.divf %25, %26 : vector<1x512xf32>
    %c0_18 = arith.constant 0 : index
    %c0_19 = arith.constant 0 : index
    %28 = vector.load %arg8[%c0_18, %c0_19] : memref<1x512xf32, #tpu.memory_space<vmem>>, vector<1x512xf32>
    tpu.vector_store %arg8[%c0_18, %c0_19], %27 {strides = array<i32>} : memref<1x512xf32, #tpu.memory_space<vmem>>, vector<1x512xf32>,
    return
  }
  func.func @transform_0(%arg0: i32) -> (i32, i32) {
    %c0_i32 = arith.constant 0 : i32
    %c0_i32_0 = arith.constant 0 : i32
    return %arg0, %c0_i32 : i32, i32
  }
  func.func @transform_1(%arg0: i32) -> (i32, i32) {
    %c0_i32 = arith.constant 0 : i32
    %c0_i32_0 = arith.constant 0 : i32
    %c0_i32_1 = arith.constant 0 : i32
    return %c0_i32, %c0_i32_0 : i32, i32
  }
  func.func @transform_2(%arg0: i32) -> (i32, i32) {
    %c0_i32 = arith.constant 0 : i32
    %c0_i32_0 = arith.constant 0 : i32
    %c0_i32_1 = arith.constant 0 : i32
    return %c0_i32, %c0_i32_0 : i32, i32
  }
  func.func @transform_3(%arg0: i32) -> (i32, i32) {
    %c0_i32 = arith.constant 0 : i32
    %c0_i32_0 = arith.constant 0 : i32
    %c0_i32_1 = arith.constant 0 : i32
    return %c0_i32, %c0_i32_0 : i32, i32
  }
  func.func @transform_4(%arg0: i32) -> (i32, i32) {
    %c0_i32 = arith.constant 0 : i32
    %c0_i32_0 = arith.constant 0 : i32
    %c0_i32_1 = arith.constant 0 : i32
    return %c0_i32, %c0_i32_0 : i32, i32
  }
  func.func @transform_5(%arg0: i32) -> (i32, i32) {
    %c0_i32 = arith.constant 0 : i32
    %c0_i32_0 = arith.constant 0 : i32
    %c0_i32_1 = arith.constant 0 : i32
    return %c0_i32, %c0_i32_0 : i32, i32
  }
  func.func @transform_6(%arg0: i32) -> (i32, i32) {
    %c0_i32 = arith.constant 0 : i32
    %c0_i32_0 = arith.constant 0 : i32
    %c0_i32_1 = arith.constant 0 : i32
    return %c0_i32, %c0_i32_0 : i32, i32
  }
  func.func @transform_7(%arg0: i32) -> (i32, i32) {
    %c0_i32 = arith.constant 0 : i32
    %c0_i32_0 = arith.constant 0 : i32
    return %c0_i32, %arg0 : i32, i32
  }
}

</mosaic_0001>

<bundles_post_ra>
// kernel: tpu_custom_call.1
= control target key start
LH: loop header
LB: loop body
LE: loop exit
PB: predicated region body
PF: predicated region fallthrough
CT: control target
= control target key end

     0   :  { %13 = vsyncpa [#allocation4], 0  ;;  %s3300_s0 = inlined_call_operand.hbm [shape: f32[300,256], index: 0, kind: input, shape index: {}]   ;;  %s3301_s1 = inlined_call_operand.hbm [shape: bf16[256,256], index: 1, kind: input, shape index: {}]   ;;  %s3302_s2 = inlined_call_operand.vmem [shape: f32[1,256], index: 2, kind: input, shape index: {}]   ;;  %s3303_s3 = inlined_call_operand.hbm [shape: bf16[256,128], index: 3, kind: input, shape index: {}]   ;;  %s3304_s4 = inlined_call_operand.vmem [shape: f32[1,128], index: 4, kind: input, shape index: {}]   ;;  %s3305_s5 = inlined_call_operand.vmem [shape: bf16[1,128], index: 5, kind: input, shape index: {}]   ;;  %s3306_s6 = inlined_call_operand.<no memory space> [shape: f32[1,1], index: 6, kind: input, shape index: {}]   ;;  %s3307_s7 = inlined_call_operand.hbm [shape: f32[1,300], index: 7, kind: output, shape index: {}]  }
   0x1   :  { %14 = vsyncpa [#allocation7], 0 }
   0x2   :  { %15 = vsyncpa [#allocation5], 0  ;;  %s33_s26 = sshll.u32 %s3301_s1, 4  ;;  %s34_s26 = int_to_ptr.hbm [resolvable:$true] %s33_s26 }
   0x3   :  { %19 = vsyncadd [#allocation4], 6656  ;;  %s2458_s27 = smov [#allocation6]   ;;  %s20_s8 = sshll.u32 %s3300_s0, 4  ;;  %s21_s8 = int_to_ptr.hbm [resolvable:$true] %s20_s8 }
   0x4   :  { %s35_s28 = sshll.u32 %s2458_s27, 4  ;;  %s2459_s9 = smov 128   ;;  %s36_s28 = int_to_ptr.vmem [resolvable:$true] %s35_s28 }
   0x5   :  { %s2460_s10 = smov 8   ;;  %s2461_s11 = smov [#allocation3]  }
   0x6   :  { %41 = dma.hbm_to_vmem [thread:$0]  %s34_s26, 4096, %s36_s28, [#allocation7], %s2459_s9, %s2459_s9, %s2460_s10  }
   0x7   :  { %s22_s12 = sshll.u32 %s2461_s11, 4  ;;  %s2462_s13 = smov 256   ;;  %s23_s12 = int_to_ptr.vmem [resolvable:$true] %s22_s12 }
   0x8   :  { %s2463_s14 = smov 16   ;;  %s48_s16 = sshll.u32 %s3303_s3, 4  ;;  %s49_s16 = int_to_ptr.hbm [resolvable:$true] %s48_s16 }
   0x9   :  { %28 = dma.hbm_to_vmem [thread:$0]  %s21_s8, 9728, %s23_s12, [#allocation4], %s2462_s13, %s2462_s13, %s2463_s14  }
   0xa   :  { %s2464_s17 = smov [#allocation8]   ;;  %s2465_s19 = smov 64  }
   0xb   :  { %s50_s18 = sshll.u32 %s2464_s17, 4  ;;  %s2466_s0 = smov 4   ;;  %s51_s18 = int_to_ptr.vmem [resolvable:$true] %s50_s18 }
   0xc   :  { %56 = dma.hbm_to_vmem [thread:$0]  %s49_s16, 2048, %s51_s18, [#allocation7], %s2465_s19, %s2465_s19, %s2466_s0  }
   0xd   :  { %2452 = dma.done.wait [#allocation4], 16384  }
   0xe   :  { %2453 = vsyncadd [#allocation4], 4294950912 }
   0xf   :  { %2454 = dma.done.wait [#allocation7], 6144  }
  0x10   :  { %2455 = vsyncadd [#allocation7], 4294961152  ;;  %v2125_v0 = vld [vmem:[#allocation6 + $0x70] sm:$0xf]  ;;  %v2278_v1 = vld [vmem:[#allocation6 + $0x74] sm:$0xf0] }
  0x11   :  { %v2189_v2 = vld [vmem:[#allocation6 + $0xf0] sm:$0xf]  ;;  %v2126_v3 = vor.u32 %v2278_v1, %v2125_v0  ;;  %v2294_v4 = vld [vmem:[#allocation6 + $0xf4] sm:$0xf0]  ;;  %v2117_v5 = vld [vmem:[#allocation6 + $0x60] sm:$0xf] }
  0x12   :  { %v2276_v6 = vld [vmem:[#allocation6 + $0x64] sm:$0xf0]  ;;  %v2190_v7 = vor.u32 %v2294_v4, %v2189_v2  ;;  %v2181_v8 = vld [vmem:[#allocation6 + $0xe0] sm:$0xf]  ;;  %v2109_v12 = vld [vmem:[#allocation6 + $0x50] sm:$0xf] }
  0x13   :  { %v2292_v9 = vld [vmem:[#allocation6 + $0xe4] sm:$0xf0]  ;;  %465 = vmatpush.bf16.msra.mxu0 %v2126_v3  ;;  %2311 = vmatpush.bf16.msra.mxu2 %v2126_v3  ;;  %v2118_v10 = vor.u32 %v2276_v6, %v2117_v5  ;;  %v2274_v13 = vld [vmem:[#allocation6 + $0x54] sm:$0xf0]  ;;  %v2173_v14 = vld [vmem:[#allocation6 + $0xd0] sm:$0xf] }
  0x14   :  { %2319 = vmatpush.bf16.msra.mxu3 %v2190_v7  ;;  %v2182_v11 = vor.u32 %v2292_v9, %v2181_v8  ;;  %634 = vmatpush.bf16.msra.mxu1 %v2190_v7  ;;  %v2290_v15 = vld [vmem:[#allocation6 + $0xd4] sm:$0xf0]  ;;  %v2110_v16 = vor.u32 %v2274_v13, %v2109_v12  ;;  %v2101_v18 = vld [vmem:[#allocation6 + $0x40] sm:$0xf]  ;;  %v2272_v19 = vld [vmem:[#allocation6 + $0x44] sm:$0xf0] }
  0x15   :  { %v2174_v17 = vor.u32 %v2290_v15, %v2173_v14  ;;  %v2165_v20 = vld [vmem:[#allocation6 + $0xc0] sm:$0xf]  ;;  %v2288_v21 = vld [vmem:[#allocation6 + $0xc4] sm:$0xf0]  ;;  %v2102_v22 = vor.u32 %v2272_v19, %v2101_v18  ;;  %v2093_v24 = vld [vmem:[#allocation6 + $0x30] sm:$0xf] }
  0x16   :  { %v2166_v23 = vor.u32 %v2288_v21, %v2165_v20  ;;  %v2270_v25 = vld [vmem:[#allocation6 + $0x34] sm:$0xf0]  ;;  %v2157_v26 = vld [vmem:[#allocation6 + $0xb0] sm:$0xf]  ;;  %v2085_v30 = vld [vmem:[#allocation6 + $0x20] sm:$0xf] }
  0x17   :  { %466 = vmatpush.bf16.msra.mxu0 %v2118_v10  ;;  %2312 = vmatpush.bf16.msra.mxu2 %v2118_v10  ;;  %v2286_v27 = vld [vmem:[#allocation6 + $0xb4] sm:$0xf0]  ;;  %v2094_v28 = vor.u32 %v2270_v25, %v2093_v24  ;;  %v2268_v31 = vld [vmem:[#allocation6 + $0x24] sm:$0xf0]  ;;  %v2149_v32 = vld [vmem:[#allocation6 + $0xa0] sm:$0xf] }
  0x18   :  { %2320 = vmatpush.bf16.msra.mxu3 %v2182_v11  ;;  %635 = vmatpush.bf16.msra.mxu1 %v2182_v11  ;;  %v2158_v29 = vor.u32 %v2286_v27, %v2157_v26  ;;  %v2284_v33 = vld [vmem:[#allocation6 + $0xa4] sm:$0xf0]  ;;  %v2086_v34 = vor.u32 %v2268_v31, %v2085_v30  ;;  %v2077_v36 = vld [vmem:[#allocation6 + $0x10] sm:$0xf]  ;;  %v2266_v37 = vld [vmem:[#allocation6 + $0x14] sm:$0xf0] }
  0x19   :  { %v2150_v35 = vor.u32 %v2284_v33, %v2149_v32  ;;  %v2141_v38 = vld [vmem:[#allocation6 + $0x90] sm:$0xf]  ;;  %v2282_v39 = vld [vmem:[#allocation6 + $0x94] sm:$0xf0]  ;;  %v2078_v40 = vor.u32 %v2266_v37, %v2077_v36  ;;  %v2069_v42 = vld [vmem:[#allocation6] sm:$0xf] }
  0x1a   :  { %v2142_v41 = vor.u32 %v2282_v39, %v2141_v38  ;;  %v2264_v43 = vld [vmem:[#allocation6 + $0x4] sm:$0xf0]  ;;  %v2133_v44 = vld [vmem:[#allocation6 + $0x80] sm:$0xf]  ;;  %v77_v48 = vld [vmem:[#allocation3 + $0x10] sm:$0xff] }
  0x1b   :  { %467 = vmatpush.bf16.msra.mxu0 %v2110_v16  ;;  %2313 = vmatpush.bf16.msra.mxu2 %v2110_v16  ;;  %v2280_v45 = vld [vmem:[#allocation6 + $0x84] sm:$0xf0]  ;;  %v75_v46 = vld [vmem:[#allocation3] sm:$0xff]  ;;  %v2070_v47 = vor.u32 %v2264_v43, %v2069_v42  ;;  %v153_v50 = vld [vmem:[#allocation3 + $0x270] sm:$0xff] }
  0x1c   :  { %2321 = vmatpush.bf16.msra.mxu3 %v2174_v17  ;;  %636 = vmatpush.bf16.msra.mxu1 %v2174_v17  ;;  %v151_v49 = vld [vmem:[#allocation3 + $0x260] sm:$0xff]  ;;  %v2134_v51 = vor.u32 %v2280_v45, %v2133_v44  ;;  %v152_v52 = vld [vmem:[#allocation3 + $0x268] sm:$0xff]  ;;  %v154_v53 = vld [vmem:[#allocation3 + $0x278] sm:$0xff]  ;;  %v2517_v54 = vpack.c.bf16 %v77_v48, %v75_v46 }
  0x1d   :  { %v2519_v55 = vpack.c.bf16 %v153_v50, %v151_v49  ;;  %v2521_v56 = vpack.c.bf16 %v154_v53, %v152_v52  ;;  %v76_v57 = vld [vmem:[#allocation3 + $0x8] sm:$0xff]  ;;  %v78_v58 = vld [vmem:[#allocation3 + $0x18] sm:$0xff]  ;;  %v79_v60 = vld [vmem:[#allocation3 + $0x20] sm:$0xff] }
  0x1e   :  { %v2526_v59 = vpack.c.bf16 %v78_v58, %v76_v57  ;;  %v81_v61 = vld [vmem:[#allocation3 + $0x30] sm:$0xff]  ;;  %v155_v62 = vld [vmem:[#allocation3 + $0x280] sm:$0xff]  ;;  %v156_v0 = vld [vmem:[#allocation3 + $0x288] sm:$0xff] }
  0x1f   :  { %468 = vmatpush.bf16.msra.mxu0 %v2102_v22  ;;  %2314 = vmatpush.bf16.msra.mxu2 %v2102_v22  ;;  %v157_v63 = vld [vmem:[#allocation3 + $0x290] sm:$0xff]  ;;  %v158_v1 = vld [vmem:[#allocation3 + $0x298] sm:$0xff]  ;;  %v2529_v2 = vpack.c.bf16 %v81_v61, %v79_v60  ;;  %v80_v5 = vld [vmem:[#allocation3 + $0x28] sm:$0xff] }
  0x20   :  { %2322 = vmatpush.bf16.msra.mxu3 %v2166_v23  ;;  %637 = vmatpush.bf16.msra.mxu1 %v2166_v23  ;;  %v2531_v3 = vpack.c.bf16 %v157_v63, %v155_v62  ;;  %v2533_v4 = vpack.c.bf16 %v158_v1, %v156_v0  ;;  %v82_v6 = vld [vmem:[#allocation3 + $0x38] sm:$0xff]  ;;  %v83_v8 = vld [vmem:[#allocation3 + $0x40] sm:$0xff]  ;;  %v85_v9 = vld [vmem:[#allocation3 + $0x50] sm:$0xff] }
  0x21   :  { %v2538_v7 = vpack.c.bf16 %v82_v6, %v80_v5  ;;  %v159_v10 = vld [vmem:[#allocation3 + $0x2a0] sm:$0xff]  ;;  %v161_v11 = vld [vmem:[#allocation3 + $0x2b0] sm:$0xff]  ;;  %v160_v12 = vld [vmem:[#allocation3 + $0x2a8] sm:$0xff]  ;;  %v2541_v14 = vpack.c.bf16 %v85_v9, %v83_v8 }
  0x22   :  { %v162_v13 = vld [vmem:[#allocation3 + $0x2b8] sm:$0xff]  ;;  %v2543_v15 = vpack.c.bf16 %v161_v11, %v159_v10  ;;  %v84_v17 = vld [vmem:[#allocation3 + $0x48] sm:$0xff]  ;;  %v87_v20 = vld [vmem:[#allocation3 + $0x60] sm:$0xff] }
  0x23   :  { %469 = vmatpush.bf16.msra.mxu0 %v2094_v28  ;;  %2315 = vmatpush.bf16.msra.mxu2 %v2094_v28  ;;  %v2545_v16 = vpack.c.bf16 %v162_v13, %v160_v12  ;;  %v86_v18 = vld [vmem:[#allocation3 + $0x58] sm:$0xff]  ;;  %v89_v21 = vld [vmem:[#allocation3 + $0x70] sm:$0xff]  ;;  %v163_v22 = vld [vmem:[#allocation3 + $0x2c0] sm:$0xff] }
  0x24   :  { %2323 = vmatpush.bf16.msra.mxu3 %v2158_v29  ;;  %638 = vmatpush.bf16.msra.mxu1 %v2158_v29  ;;  %v2550_v19 = vpack.c.bf16 %v86_v18, %v84_v17  ;;  %v165_v23 = vld [vmem:[#allocation3 + $0x2d0] sm:$0xff]  ;;  %v164_v24 = vld [vmem:[#allocation3 + $0x2c8] sm:$0xff]  ;;  %v166_v25 = vld [vmem:[#allocation3 + $0x2d8] sm:$0xff]  ;;  %v2553_v26 = vpack.c.bf16 %v89_v21, %v87_v20 }
  0x25   :  { %v2555_v27 = vpack.c.bf16 %v165_v23, %v163_v22  ;;  %v2557_v28 = vpack.c.bf16 %v166_v25, %v164_v24  ;;  %v88_v29 = vld [vmem:[#allocation3 + $0x68] sm:$0xff]  ;;  %v90_v30 = vld [vmem:[#allocation3 + $0x78] sm:$0xff]  ;;  %v91_v32 = vld [vmem:[#allocation3 + $0x80] sm:$0xff] }
  0x26   :  { %v2562_v31 = vpack.c.bf16 %v90_v30, %v88_v29  ;;  %v93_v33 = vld [vmem:[#allocation3 + $0x90] sm:$0xff]  ;;  %v168_v36 = vld [vmem:[#allocation3 + $0x2e8] sm:$0xff]  ;;  %v170_v37 = vld [vmem:[#allocation3 + $0x2f8] sm:$0xff] }
  0x27   :  { %470 = vmatpush.bf16.msra.mxu0 %v2086_v34  ;;  %2316 = vmatpush.bf16.msra.mxu2 %v2086_v34  ;;  %3327 = vst [vmem:[#allocation13_spill] sm:$0xff] %v2557_v28  ;;  %v167_v34 = vld [vmem:[#allocation3 + $0x2e0] sm:$0xff]  ;;  %v2565_v38 = vpack.c.bf16 %v93_v33, %v91_v32  ;;  %v94_v42 = vld [vmem:[#allocation3 + $0x98] sm:$0xff]  ;;  %v97_v45 = vld [vmem:[#allocation3 + $0xb0] sm:$0xff] }
  0x28   :  { %2324 = vmatpush.bf16.msra.mxu3 %v2150_v35  ;;  %639 = vmatpush.bf16.msra.mxu1 %v2150_v35  ;;  %v169_v35 = vld [vmem:[#allocation3 + $0x2f0] sm:$0xff]  ;;  %v95_v44 = vld [vmem:[#allocation3 + $0xa0] sm:$0xff]  ;;  %v172_v48 = vld [vmem:[#allocation3 + $0x308] sm:$0xff] }
  0x29   :  { %v2567_v39 = vpack.c.bf16 %v169_v35, %v167_v34  ;;  %v171_v46 = vld [vmem:[#allocation3 + $0x300] sm:$0xff]  ;;  %v174_v49 = vld [vmem:[#allocation3 + $0x318] sm:$0xff]  ;;  %v2577_v50 = vpack.c.bf16 %v97_v45, %v95_v44  ;;  %v96_v53 = vld [vmem:[#allocation3 + $0xa8] sm:$0xff] }
  0x2a   :  { %v2581_v52 = vpack.c.bf16 %v174_v49, %v172_v48  ;;  %v98_v57 = vld [vmem:[#allocation3 + $0xb8] sm:$0xff]  ;;  %v99_v60 = vld [vmem:[#allocation3 + $0xc0] sm:$0xff]  ;;  %v101_v61 = vld [vmem:[#allocation3 + $0xd0] sm:$0xff] }
  0x2b   :  { %471 = vmatpush.bf16.msra.mxu0 %v2078_v40  ;;  %2317 = vmatpush.bf16.msra.mxu2 %v2078_v40  ;;  %3328 = vst [vmem:[#allocation14_spill] sm:$0xff] %v2567_v39  ;;  %v2569_v40 = vpack.c.bf16 %v170_v37, %v168_v36  ;;  %v2586_v58 = vpack.c.bf16 %v98_v57, %v96_v53  ;;  %v175_v62 = vld [vmem:[#allocation3 + $0x320] sm:$0xff]  ;;  %v177_v63 = vld [vmem:[#allocation3 + $0x330] sm:$0xff]  ;;  %v176_v0 = vld [vmem:[#allocation3 + $0x328] sm:$0xff] }
  0x2c   :  { %2325 = vmatpush.bf16.msra.mxu3 %v2142_v41  ;;  %640 = vmatpush.bf16.msra.mxu1 %v2142_v41  ;;  %v92_v41 = vld [vmem:[#allocation3 + $0x88] sm:$0xff]  ;;  %3331 = vst [vmem:[#allocation17_spill] sm:$0xff] %v2581_v52  ;;  %v178_v1 = vld [vmem:[#allocation3 + $0x338] sm:$0xff]  ;;  %v2589_v5 = vpack.c.bf16 %v101_v61, %v99_v60  ;;  %v2591_v6 = vpack.c.bf16 %v177_v63, %v175_v62  ;;  %v103_v9 = vld [vmem:[#allocation3 + $0xe0] sm:$0xff] }
  0x2d   :  { %3329 = vst [vmem:[#allocation15_spill] sm:$0xff] %v2569_v40  ;;  %v2574_v43 = vpack.c.bf16 %v94_v42, %v92_v41  ;;  %v2593_v8 = vpack.c.bf16 %v178_v1, %v176_v0  ;;  %v105_v10 = vld [vmem:[#allocation3 + $0xf0] sm:$0xff]  ;;  %v179_v11 = vld [vmem:[#allocation3 + $0x340] sm:$0xff]  ;;  %v180_v13 = vld [vmem:[#allocation3 + $0x348] sm:$0xff] }
  0x2e   :  { %3332 = vst [vmem:[#allocation18_spill] sm:$0xff] %v2591_v6  ;;  %v181_v12 = vld [vmem:[#allocation3 + $0x350] sm:$0xff]  ;;  %v182_v17 = vld [vmem:[#allocation3 + $0x358] sm:$0xff]  ;;  %v100_v18 = vld [vmem:[#allocation3 + $0xc8] sm:$0xff]  ;;  %v2600_v22 = vpack.c.bf16 %v105_v10, %v103_v9 }
  0x2f   :  { %472 = vmatpush.bf16.msra.mxu0 %v2070_v47  ;;  %2318 = vmatpush.bf16.msra.mxu2 %v2070_v47  ;;  %v173_v47 = vld [vmem:[#allocation3 + $0x310] sm:$0xff]  ;;  %3333 = vst [vmem:[#allocation19_spill] sm:$0xff] %v2593_v8  ;;  %v102_v20 = vld [vmem:[#allocation3 + $0xd8] sm:$0xff]  ;;  %v2602_v23 = vpack.c.bf16 %v181_v12, %v179_v11  ;;  %v2604_v24 = vpack.c.bf16 %v182_v17, %v180_v13  ;;  %v107_v25 = vld [vmem:[#allocation3 + $0x100] sm:$0xff] }
  0x30   :  { %2326 = vmatpush.bf16.msra.mxu3 %v2134_v51  ;;  %641 = vmatpush.bf16.msra.mxu1 %v2134_v51  ;;  %v2579_v51 = vpack.c.bf16 %v173_v47, %v171_v46  ;;  %v2598_v21 = vpack.c.bf16 %v102_v20, %v100_v18  ;;  %v109_v29 = vld [vmem:[#allocation3 + $0x110] sm:$0xff]  ;;  %v183_v30 = vld [vmem:[#allocation3 + $0x360] sm:$0xff]  ;;  %v184_v33 = vld [vmem:[#allocation3 + $0x368] sm:$0xff] }
  0x31   :  { %3334 = vst [vmem:[#allocation20_spill] sm:$0xff] %v2602_v23  ;;  %v185_v32 = vld [vmem:[#allocation3 + $0x370] sm:$0xff]  ;;  %v186_v34 = vld [vmem:[#allocation3 + $0x378] sm:$0xff]  ;;  %v104_v35 = vld [vmem:[#allocation3 + $0xe8] sm:$0xff]  ;;  %v2612_v41 = vpack.c.bf16 %v109_v29, %v107_v25 }
  0x32   :  { %473 = vmatmul.bf16.vlgmr.msra.gmra.mxu0 %v2517_v54  ;;  %568 = vmatmul.bf16.vlgmr.msra.gmra.mxu2 %v2519_v55  ;;  %3330 = vst [vmem:[#allocation16_spill] sm:$0xff] %v2579_v51  ;;  %v106_v36 = vld [vmem:[#allocation3 + $0xf8] sm:$0xff]  ;;  %v2614_v42 = vpack.c.bf16 %v185_v32, %v183_v30  ;;  %v299_v44 = vld [vmem:[%s3302_s2] sm:$0x3]  ;;  %v2619_v46 = vpack.c.bf16 %v186_v34, %v184_v33  ;;  %v113_v63 = vld [vmem:[#allocation3 + $0x130] sm:$0xff] }
  0x33   :  { %737 = vmatmul.bf16.vlgmr.msra.gmra.mxu3 %v2521_v56  ;;  %642 = vmatmul.bf16.vlgmr.msra.gmra.mxu1 %v2526_v59  ;;  %3335 = vst [vmem:[#allocation21_spill] sm:$0xff] %v2604_v24  ;;  %v2610_v37 = vpack.c.bf16 %v106_v36, %v104_v35  ;;  %v2622_v47 = vperm.slane %v299_v44, 0  ;;  %v111_v62 = vld [vmem:[#allocation3 + $0x120] sm:$0xff]  ;;  %v189_v9 = vld [vmem:[#allocation3 + $0x390] sm:$0xff]  ;;  %v188_v10 = vld [vmem:[#allocation3 + $0x388] sm:$0xff] }
  0x34   :  { %3336 = vst [vmem:[#allocation22_spill] sm:$0xff] %v2614_v42  ;;  %v187_v1 = vld [vmem:[#allocation3 + $0x380] sm:$0xff]  ;;  %v190_v12 = vld [vmem:[#allocation3 + $0x398] sm:$0xff]  ;;  %v108_v13 = vld [vmem:[#allocation3 + $0x108] sm:$0xff]  ;;  %v2632_v30 = vpack.c.bf16 %v113_v63, %v111_v62 }
  0x35   :  { %3337 = vst [vmem:[#allocation23_spill] sm:$0xff] %v2619_v46  ;;  %v110_v17 = vld [vmem:[#allocation3 + $0x118] sm:$0xff]  ;;  %v2634_v32 = vpack.c.bf16 %v189_v9, %v187_v1  ;;  %v2636_v34 = vpack.c.bf16 %v190_v12, %v188_v10  ;;  %v2293_v62 = vld [vmem:[#allocation6 + $0xf4] sm:$0xf]  ;;  %v2119_v12 = vld [vmem:[#allocation6 + $0x68] sm:$0xf0] }
  0x36   :  { %v2629_v20 = vpack.c.bf16 %v110_v17, %v108_v13  ;;  %v2191_v63 = vld [vmem:[#allocation6 + $0xf8] sm:$0xf0]  ;;  %v2291_v13 = vld [vmem:[#allocation6 + $0xe4] sm:$0xf] }
  0x37   :  { %3338 = vst [vmem:[#allocation24_spill] sm:$0xff] %v2634_v32  ;;  %v2194_v9 = vor.u32 %v2293_v62, %v2191_v63  ;;  %v115_v62 = vld [vmem:[#allocation3 + $0x140] sm:$0xff]  ;;  %v117_v63 = vld [vmem:[#allocation3 + $0x150] sm:$0xff] }
  0x38   :  { %3339 = vst [vmem:[#allocation25_spill] sm:$0xff] %v2636_v34 }
  0x39   :  { %972 = vmatpush.bf16.msrb.mxu3 %v2194_v9  ;;  %v193_v9 = vld [vmem:[#allocation3 + $0x3b0] sm:$0xff] }
  0x42   :  { %478 = vmatmul.bf16.gmra.mxu0 %v2529_v2  ;;  %573 = vmatmul.bf16.gmra.mxu2 %v2531_v3 }
  0x43   :  { %742 = vmatmul.bf16.gmra.mxu3 %v2533_v4  ;;  %647 = vmatmul.bf16.gmra.mxu1 %v2538_v7 }
  0x52   :  { %483 = vmatmul.bf16.gmra.mxu0 %v2541_v14  ;;  %578 = vmatmul.bf16.gmra.mxu2 %v2543_v15 }
  0x53   :  { %747 = vmatmul.bf16.gmra.mxu3 %v2545_v16  ;;  %652 = vmatmul.bf16.gmra.mxu1 %v2550_v19 }
  0x62   :  { %488 = vmatmul.bf16.gmra.mxu0 %v2553_v26  ;;  %583 = vmatmul.bf16.gmra.mxu2 %v2555_v27 }
  0x63   :  { %752 = vmatmul.bf16.gmra.mxu3 %v2557_v28  ;;  %657 = vmatmul.bf16.gmra.mxu1 %v2562_v31 }
  0x72   :  { %493 = vmatmul.bf16.gmra.mxu0 %v2565_v38  ;;  %588 = vmatmul.bf16.gmra.mxu2 %v2567_v39  ;;  %v146_v39 = vld [vmem:[#allocation3 + $0x238] sm:$0xff] }
  0x73   :  { %757 = vmatmul.bf16.gmra.mxu3 %v2569_v40  ;;  %662 = vmatmul.bf16.gmra.mxu1 %v2574_v43  ;;  %v149_v40 = vld [vmem:[#allocation3 + $0x250] sm:$0xff] }
  0x82   :  { %498 = vmatmul.bf16.gmra.mxu0 %v2577_v50  ;;  %593 = vmatmul.bf16.gmra.mxu2 %v2579_v51  ;;  %v143_v51 = vld [vmem:[#allocation3 + $0x220] sm:$0xff] }
  0x83   :  { %762 = vmatmul.bf16.gmra.mxu3 %v2581_v52  ;;  %667 = vmatmul.bf16.gmra.mxu1 %v2586_v58  ;;  %v141_v52 = vld [vmem:[#allocation3 + $0x210] sm:$0xff] }
  0x92   :  { %503 = vmatmul.bf16.gmra.mxu0 %v2589_v5  ;;  %598 = vmatmul.bf16.gmra.mxu2 %v2591_v6 }
  0x93   :  { %767 = vmatmul.bf16.gmra.mxu3 %v2593_v8  ;;  %672 = vmatmul.bf16.gmra.mxu1 %v2598_v21 }
  0xa2   :  { %508 = vmatmul.bf16.gmra.mxu0 %v2600_v22  ;;  %603 = vmatmul.bf16.gmra.mxu2 %v2602_v23  ;;  %v198_v23 = vld [vmem:[#allocation3 + $0x3d8] sm:$0xff] }
  0xa3   :  { %772 = vmatmul.bf16.gmra.mxu3 %v2604_v24  ;;  %677 = vmatmul.bf16.gmra.mxu1 %v2610_v37 }
  0xaf   :  { %v474_v45 = vpop.f32.mrf.mxu0 }
  0xb0   :  { %v475_v57 = vadd.f32 %v474_v45, %v2622_v47  ;;  %v643_v0 = vpop.f32.mrf.mxu1 }
  0xb2   :  { %513 = vmatmul.bf16.gmra.mxu0 %v2612_v41  ;;  %608 = vmatmul.bf16.gmra.mxu2 %v2614_v42  ;;  %v644_v11 = vadd.f32 %v643_v0, %v475_v57 }
  0xb3   :  { %777 = vmatmul.bf16.gmra.mxu3 %v2619_v46  ;;  %682 = vmatmul.bf16.gmra.mxu1 %v2629_v20  ;;  %v2287_v46 = vld [vmem:[#allocation6 + $0xc4] sm:$0xf] }
  0xb4   :  { %v1141_v0 = vmax.f32 %v644_v11, 0.0 }
  0xb5   :  { %v569_v48 = vpop.f32.mrf.mxu2 }
  0xb6   :  { %v570_v49 = vadd.f32 %v569_v48, %v2622_v47  ;;  %v738_v53 = vpop.f32.mrf.mxu3  ;;  %v2277_v48 = vld [vmem:[#allocation6 + $0x74] sm:$0xf] }
  0xb7   :  { %v476_v60 = vpop.f32.mrf.mxu0 }
  0xb8   :  { %v739_v61 = vadd.f32 %v738_v53, %v570_v49  ;;  %v477_v35 = vadd.f32 %v476_v60, %v2622_v47  ;;  %v2127_v49 = vld [vmem:[#allocation6 + $0x78] sm:$0xf0]  ;;  %v645_v53 = vpop.f32.mrf.mxu1 }
  0xb9   :  { %v2130_v57 = vor.u32 %v2277_v48, %v2127_v49 }
  0xba   :  { %v1217_v44 = vmax.f32 %v739_v61, 0.0  ;;  %v646_v1 = vadd.f32 %v645_v53, %v477_v35  ;;  %v2275_v61 = vld [vmem:[#allocation6 + $0x64] sm:$0xf] }
  0xbb   :  { %803 = vmatpush.bf16.msrb.mxu2 %v2130_v57  ;;  %v2289_v57 = vld [vmem:[#allocation6 + $0xd4] sm:$0xf] }
  0xbd   :  { %v571_v18 = vpop.f32.mrf.mxu2 }
  0xbe   :  { %v572_v25 = vadd.f32 %v571_v18, %v2622_v47  ;;  %v740_v29 = vpop.f32.mrf.mxu3 }
  0xbf   :  { %v479_v33 = vpop.f32.mrf.mxu0 }
  0xc0   :  { %v741_v36 = vadd.f32 %v740_v29, %v572_v25  ;;  %v1143_v25 = vmax.f32 %v646_v1, 0.0  ;;  %v2122_v29 = vor.u32 %v2275_v61, %v2119_v12  ;;  %v480_v11 = vadd.f32 %v479_v33, %v2622_v47  ;;  %v191_v1 = vld [vmem:[#allocation3 + $0x3a0] sm:$0xff]  ;;  %v192_v61 = vld [vmem:[#allocation3 + $0x3a8] sm:$0xff]  ;;  %v648_v12 = vpop.f32.mrf.mxu1 }
  0xc1   :  { %v112_v33 = vld [vmem:[#allocation3 + $0x128] sm:$0xff]  ;;  %v2654_v42 = vpack.c.bf16 %v193_v9, %v191_v1  ;;  %v2285_v9 = vld [vmem:[#allocation6 + $0xb4] sm:$0xf] }
  0xc2   :  { %v1219_v45 = vmax.f32 %v741_v36, 0.0  ;;  %518 = vmatmul.bf16.gmra.mxu0 %v2632_v30  ;;  %613 = vmatmul.bf16.gmra.mxu2 %v2634_v32  ;;  %v2183_v36 = vld [vmem:[#allocation6 + $0xe8] sm:$0xf0]  ;;  %v2647_v53 = vpack.c.bf16 %v1143_v25, %v1141_v0  ;;  %v2271_v25 = vld [vmem:[#allocation6 + $0x44] sm:$0xf] }
  0xc3   :  { %782 = vmatmul.bf16.gmra.mxu3 %v2636_v34  ;;  %v2186_v49 = vor.u32 %v2291_v13, %v2183_v36  ;;  %804 = vmatpush.bf16.msrb.mxu2 %v2122_v29  ;;  %v2175_v34 = vld [vmem:[#allocation6 + $0xd8] sm:$0xf0]  ;;  %v649_v36 = vadd.f32 %v648_v12, %v480_v11  ;;  %v2103_v29 = vld [vmem:[#allocation6 + $0x48] sm:$0xf0]  ;;  %3341 = vst [vmem:[#allocation27_spill] sm:$0xff] %v2654_v42 }
  0xc4   :  { %v2643_v10 = vpack.c.bf16 %v1219_v45, %v1217_v44  ;;  %v2273_v44 = vld [vmem:[#allocation6 + $0x54] sm:$0xf]  ;;  %v2111_v45 = vld [vmem:[#allocation6 + $0x58] sm:$0xf0]  ;;  %v2178_v32 = vor.u32 %v2289_v57, %v2175_v34  ;;  %v2106_v34 = vor.u32 %v2271_v25, %v2103_v29  ;;  %v2167_v57 = vld [vmem:[#allocation6 + $0xc8] sm:$0xf0] }
  0xc5   :  { %v574_v60 = vpop.f32.mrf.mxu2  ;;  %973 = vmatpush.bf16.msrb.mxu3 %v2186_v49  ;;  %v194_v13 = vld [vmem:[#allocation3 + $0x3b8] sm:$0xff]  ;;  %v2267_v29 = vld [vmem:[#allocation6 + $0x24] sm:$0xf] }
  0xc6   :  { %3340 = vst [vmem:[#allocation26_spill] sm:$0xff] %v2643_v10  ;;  %v575_v17 = vadd.f32 %v574_v60, %v2622_v47  ;;  %v743_v18 = vpop.f32.mrf.mxu3  ;;  %v2114_v60 = vor.u32 %v2273_v44, %v2111_v45  ;;  %v2652_v45 = vpack.c.bf16 %v117_v63, %v115_v62  ;;  %v2656_v12 = vpack.c.bf16 %v194_v13, %v192_v61  ;;  %v2269_v62 = vld [vmem:[#allocation6 + $0x34] sm:$0xf]  ;;  %v2159_v61 = vld [vmem:[#allocation6 + $0xb8] sm:$0xf0] }
  0xc7   :  { %v481_v48 = vpop.f32.mrf.mxu0  ;;  %v1145_v13 = vmax.f32 %v649_v36, 0.0  ;;  %v2162_v25 = vor.u32 %v2285_v9, %v2159_v61  ;;  %v121_v9 = vld [vmem:[#allocation3 + $0x170] sm:$0xff] }
  0xc8   :  { %v744_v35 = vadd.f32 %v743_v18, %v575_v17  ;;  %v114_v17 = vld [vmem:[#allocation3 + $0x138] sm:$0xff]  ;;  %805 = vmatpush.bf16.msrb.mxu2 %v2114_v60  ;;  %3342 = vst [vmem:[#allocation28_spill] sm:$0xff] %v2656_v12  ;;  %v482_v60 = vadd.f32 %v481_v48, %v2622_v47  ;;  %v650_v63 = vpop.f32.mrf.mxu1 }
  0xc9   :  { %v2649_v18 = vpack.c.bf16 %v114_v17, %v112_v33  ;;  %974 = vmatpush.bf16.msrb.mxu3 %v2178_v32  ;;  %v2170_v17 = vor.u32 %v2287_v46, %v2167_v57  ;;  %v2095_v32 = vld [vmem:[#allocation6 + $0x38] sm:$0xf0] }
  0xca   :  { %v1221_v24 = vmax.f32 %v744_v35, 0.0  ;;  %v2098_v1 = vor.u32 %v2269_v62, %v2095_v32  ;;  %v651_v48 = vadd.f32 %v650_v63, %v482_v60 }
  0xcb   :  { %687 = vmatmul.bf16.gmra.mxu1 %v2649_v18 }
  0xcc   :  { %806 = vmatpush.bf16.msrb.mxu2 %v2106_v34 }
  0xcd   :  { %v576_v0 = vpop.f32.mrf.mxu2  ;;  %975 = vmatpush.bf16.msrb.mxu3 %v2170_v17  ;;  %v2079_v17 = vld [vmem:[#allocation6 + $0x18] sm:$0xf0] }
  0xce   :  { %v577_v49 = vadd.f32 %v576_v0, %v2622_v47  ;;  %v745_v44 = vpop.f32.mrf.mxu3 }
  0xcf   :  { %v484_v11 = vpop.f32.mrf.mxu0 }
  0xd0   :  { %v746_v33 = vadd.f32 %v745_v44, %v577_v49  ;;  %807 = vmatpush.bf16.msrb.mxu2 %v2098_v1  ;;  %v2087_v49 = vld [vmem:[#allocation6 + $0x28] sm:$0xf0]  ;;  %v2283_v44 = vld [vmem:[#allocation6 + $0xa4] sm:$0xf]  ;;  %v485_v32 = vadd.f32 %v484_v11, %v2622_v47 }
  0xd1   :  { %976 = vmatpush.bf16.msrb.mxu3 %v2162_v25  ;;  %v119_v1 = vld [vmem:[#allocation3 + $0x160] sm:$0xff]  ;;  %v116_v25 = vld [vmem:[#allocation3 + $0x148] sm:$0xff] }
  0xd2   :  { %v1223_v0 = vmax.f32 %v746_v33, 0.0  ;;  %523 = vmatmul.bf16.gmra.mxu0 %v2652_v45  ;;  %618 = vmatmul.bf16.gmra.mxu2 %v2654_v42  ;;  %v1147_v33 = vmax.f32 %v651_v48, 0.0  ;;  %v2151_v42 = vld [vmem:[#allocation6 + $0xa8] sm:$0xf0]  ;;  %v197_v48 = vld [vmem:[#allocation3 + $0x3d0] sm:$0xff]  ;;  %v2672_v8 = vpack.c.bf16 %v121_v9, %v119_v1 }
  0xd3   :  { %787 = vmatmul.bf16.gmra.mxu3 %v2656_v12  ;;  %v2090_v12 = vor.u32 %v2267_v29, %v2087_v49  ;;  %v2154_v60 = vor.u32 %v2283_v44, %v2151_v42  ;;  %v196_v29 = vld [vmem:[#allocation3 + $0x3c8] sm:$0xff]  ;;  %v653_v49 = vpop.f32.mrf.mxu1  ;;  %v118_v42 = vld [vmem:[#allocation3 + $0x158] sm:$0xff] }
  0xd4   :  { %v2663_v46 = vpack.c.bf16 %v1223_v0, %v1221_v24  ;;  %v2265_v24 = vld [vmem:[#allocation6 + $0x14] sm:$0xf]  ;;  %v2667_v63 = vpack.c.bf16 %v1147_v33, %v1145_v13  ;;  %v654_v11 = vadd.f32 %v653_v49, %v485_v32  ;;  %v2669_v44 = vpack.c.bf16 %v118_v42, %v116_v25  ;;  %v2263_v13 = vld [vmem:[#allocation6 + $0x4] sm:$0xf] }
  0xd5   :  { %v579_v35 = vpop.f32.mrf.mxu2  ;;  %808 = vmatpush.bf16.msrb.mxu2 %v2090_v12  ;;  %v2281_v0 = vld [vmem:[#allocation6 + $0x94] sm:$0xf]  ;;  %v2082_v61 = vor.u32 %v2265_v24, %v2079_v17  ;;  %977 = vmatpush.bf16.msrb.mxu3 %v2154_v60  ;;  %v2279_v33 = vld [vmem:[#allocation6 + $0x84] sm:$0xf]  ;;  %v2135_v60 = vld [vmem:[#allocation6 + $0x88] sm:$0xf0] }
  0xd6   :  { %3343 = vst [vmem:[#allocation29_spill] sm:$0xff] %v2663_v46  ;;  %v580_v34 = vadd.f32 %v579_v35, %v2622_v47  ;;  %v748_v57 = vpop.f32.mrf.mxu3  ;;  %v2143_v35 = vld [vmem:[#allocation6 + $0x98] sm:$0xf0]  ;;  %v195_v46 = vld [vmem:[#allocation3 + $0x3c0] sm:$0xff]  ;;  %v2138_v49 = vor.u32 %v2279_v33, %v2135_v60  ;;  %v125_v33 = vld [vmem:[#allocation3 + $0x190] sm:$0xff] }
  0xd7   :  { %v486_v62 = vpop.f32.mrf.mxu0  ;;  %v2674_v10 = vpack.c.bf16 %v197_v48, %v195_v46  ;;  %v1149_v48 = vmax.f32 %v654_v11, 0.0  ;;  %v200_v60 = vld [vmem:[#allocation3 + $0x3e8] sm:$0xff]  ;;  %v122_v11 = vld [vmem:[#allocation3 + $0x178] sm:$0xff] }
  0xd8   :  { %v749_v36 = vadd.f32 %v748_v57, %v580_v34  ;;  %v2146_v34 = vor.u32 %v2281_v0, %v2143_v35  ;;  %v2071_v57 = vld [vmem:[#allocation6 + $0x8] sm:$0xf0]  ;;  %v2676_v0 = vpack.c.bf16 %v198_v23, %v196_v29 }
  0xd9   :  { %809 = vmatpush.bf16.msrb.mxu2 %v2082_v61  ;;  %3344 = vst [vmem:[#allocation30_spill] sm:$0xff] %v2674_v10  ;;  %v2074_v6 = vor.u32 %v2263_v13, %v2071_v57  ;;  %v487_v61 = vadd.f32 %v486_v62, %v2622_v47  ;;  %v123_v57 = vld [vmem:[#allocation3 + $0x180] sm:$0xff] }
  0xda   :  { %3345 = vst [vmem:[#allocation31_spill] sm:$0xff] %v2676_v0  ;;  %978 = vmatpush.bf16.msrb.mxu3 %v2146_v34  ;;  %v1225_v25 = vmax.f32 %v749_v36, 0.0 }
  0xdb   :  { %692 = vmatmul.bf16.gmra.mxu1 %v2669_v44  ;;  %v655_v46 = vpop.f32.mrf.mxu1 }
  0xdc   :  { %v656_v23 = vadd.f32 %v655_v46, %v487_v61 }
  0xdd   :  { %v581_v12 = vpop.f32.mrf.mxu2  ;;  %810 = vmatpush.bf16.msrb.mxu2 %v2074_v6 }
  0xde   :  { %v582_v24 = vadd.f32 %v581_v12, %v2622_v47  ;;  %v750_v17 = vpop.f32.mrf.mxu3  ;;  %979 = vmatpush.bf16.msrb.mxu3 %v2138_v49  ;;  %v1151_v34 = vmax.f32 %v656_v23, 0.0 }
  0xdf   :  { %v489_v32 = vpop.f32.mrf.mxu0 }
  0xe0   :  { %v751_v35 = vadd.f32 %v750_v17, %v582_v24  ;;  %v490_v36 = vadd.f32 %v489_v32, %v2622_v47  ;;  %v2687_v13 = vpack.c.bf16 %v1151_v34, %v1149_v48  ;;  %v199_v24 = vld [vmem:[#allocation3 + $0x3e0] sm:$0xff]  ;;  %v201_v17 = vld [vmem:[#allocation3 + $0x3f0] sm:$0xff]  ;;  %v2692_v32 = vpack.c.bf16 %v125_v33, %v123_v57 }
  0xe1   :  { %v2694_v48 = vpack.c.bf16 %v201_v17, %v199_v24 }
  0xe2   :  { %v1227_v42 = vmax.f32 %v751_v35, 0.0  ;;  %528 = vmatmul.bf16.gmra.mxu0 %v2672_v8  ;;  %623 = vmatmul.bf16.gmra.mxu2 %v2674_v10  ;;  %v202_v35 = vld [vmem:[#allocation3 + $0x3f8] sm:$0xff]  ;;  %v124_v10 = vld [vmem:[#allocation3 + $0x188] sm:$0xff] }
  0xe3   :  { %792 = vmatmul.bf16.gmra.mxu3 %v2676_v0  ;;  %v658_v61 = vpop.f32.mrf.mxu1  ;;  %3347 = vst [vmem:[#allocation33_spill] sm:$0xff] %v2694_v48 }
  0xe4   :  { %v2683_v1 = vpack.c.bf16 %v1227_v42, %v1225_v25  ;;  %v659_v49 = vadd.f32 %v658_v61, %v490_v36  ;;  %v120_v25 = vld [vmem:[#allocation3 + $0x168] sm:$0xff] }
  0xe5   :  { %v584_v9 = vpop.f32.mrf.mxu2  ;;  %v2689_v46 = vpack.c.bf16 %v122_v11, %v120_v25 }
  0xe6   :  { %3346 = vst [vmem:[#allocation32_spill] sm:$0xff] %v2683_v1  ;;  %v585_v62 = vadd.f32 %v584_v9, %v2622_v47  ;;  %v753_v29 = vpop.f32.mrf.mxu3  ;;  %v128_v1 = vld [vmem:[#allocation3 + $0x1a8] sm:$0xff] }
  0xe7   :  { %v491_v6 = vpop.f32.mrf.mxu0 }
  0xe8   :  { %v754_v12 = vadd.f32 %v753_v29, %v585_v62  ;;  %v2696_v29 = vpack.c.bf16 %v202_v35, %v200_v60  ;;  %v492_v34 = vadd.f32 %v491_v6, %v2622_v47  ;;  %v1153_v60 = vmax.f32 %v659_v49, 0.0 }
  0xea   :  { %3348 = vst [vmem:[#allocation34_spill] sm:$0xff] %v2696_v29  ;;  %v1229_v61 = vmax.f32 %v754_v12, 0.0 }
  0xeb   :  { %697 = vmatmul.bf16.gmra.mxu1 %v2689_v46  ;;  %v660_v57 = vpop.f32.mrf.mxu1 }
  0xec   :  { %v661_v33 = vadd.f32 %v660_v57, %v492_v34  ;;  %v126_v34 = vld [vmem:[#allocation3 + $0x198] sm:$0xff] }
  0xed   :  { %v586_v42 = vpop.f32.mrf.mxu2 }
  0xee   :  { %v587_v23 = vadd.f32 %v586_v42, %v2622_v47  ;;  %v755_v9 = vpop.f32.mrf.mxu3  ;;  %v1155_v11 = vmax.f32 %v661_v33, 0.0 }
  0xef   :  { %v494_v62 = vpop.f32.mrf.mxu0 }
  0xf0   :  { %v756_v36 = vadd.f32 %v755_v9, %v587_v23  ;;  %v495_v12 = vadd.f32 %v494_v62, %v2622_v47  ;;  %v2707_v23 = vpack.c.bf16 %v1155_v11, %v1153_v60  ;;  %v127_v9 = vld [vmem:[#allocation3 + $0x1a0] sm:$0xff] }
  0xf2   :  { %v1231_v0 = vmax.f32 %v756_v36, 0.0  ;;  %533 = vmatmul.bf16.gmra.mxu0 %v2692_v32  ;;  %628 = vmatmul.bf16.gmra.mxu2 %v2694_v48  ;;  %v129_v36 = vld [vmem:[#allocation3 + $0x1b0] sm:$0xff] }
  0xf3   :  { %797 = vmatmul.bf16.gmra.mxu3 %v2696_v29  ;;  %v663_v48 = vpop.f32.mrf.mxu1 }
  0xf4   :  { %v2703_v24 = vpack.c.bf16 %v1231_v0, %v1229_v61  ;;  %v664_v29 = vadd.f32 %v663_v48, %v495_v12  ;;  %v2709_v61 = vpack.c.bf16 %v126_v34, %v124_v10 }
  0xf5   :  { %v589_v17 = vpop.f32.mrf.mxu2 }
  0xf6   :  { %3349 = vst [vmem:[#allocation35_spill] sm:$0xff] %v2703_v24  ;;  %v590_v35 = vadd.f32 %v589_v17, %v2622_v47  ;;  %v758_v25 = vpop.f32.mrf.mxu3  ;;  %v2712_v17 = vpack.c.bf16 %v129_v36, %v127_v9  ;;  %v1157_v9 = vmax.f32 %v664_v29, 0.0 }
  0xf7   :  { %v496_v6 = vpop.f32.mrf.mxu0 }
  0xf8   :  { %v759_v42 = vadd.f32 %v758_v25, %v590_v35  ;;  %v497_v62 = vadd.f32 %v496_v6, %v2622_v47 }
  0xfa   :  { %v1233_v35 = vmax.f32 %v759_v42, 0.0 }
  0xfb   :  { %702 = vmatmul.bf16.gmra.mxu1 %v2709_v61  ;;  %v665_v10 = vpop.f32.mrf.mxu1 }
  0xfc   :  { %v666_v48 = vadd.f32 %v665_v10, %v497_v62  ;;  %v130_v62 = vld [vmem:[#allocation3 + $0x1b8] sm:$0xff] }
  0xfd   :  { %v591_v0 = vpop.f32.mrf.mxu2 }
  0xfe   :  { %v592_v49 = vadd.f32 %v591_v0, %v2622_v47  ;;  %v760_v57 = vpop.f32.mrf.mxu3  ;;  %v1159_v0 = vmax.f32 %v666_v48, 0.0 }
  0xff   :  { %v499_v33 = vpop.f32.mrf.mxu0 }
 0x100   :  { %v761_v60 = vadd.f32 %v760_v57, %v592_v49  ;;  %v500_v42 = vadd.f32 %v499_v33, %v2622_v47  ;;  %v2723_v57 = vpack.c.bf16 %v1159_v0, %v1157_v9 }
 0x102   :  { %v1235_v25 = vmax.f32 %v761_v60, 0.0  ;;  %538 = vmatmul.bf16.gmra.mxu0 %v2712_v17  ;;  %811 = vmatmul.bf16.vlgmr.msrb.gmra.mxu2 %v2517_v54  ;;  %v131_v60 = vld [vmem:[#allocation3 + $0x1c0] sm:$0xff]  ;;  %v133_v54 = vld [vmem:[#allocation3 + $0x1d0] sm:$0xff] }
 0x103   :  { %980 = vmatmul.bf16.vlgmr.msrb.gmra.mxu3 %v2526_v59  ;;  %v668_v24 = vpop.f32.mrf.mxu1 }
 0x104   :  { %v2719_v11 = vpack.c.bf16 %v1235_v25, %v1233_v35  ;;  %v669_v59 = vadd.f32 %v668_v24, %v500_v42  ;;  %v2725_v25 = vpack.c.bf16 %v130_v62, %v128_v1 }
 0x105   :  { %v594_v12 = vpop.f32.mrf.mxu2 }
 0x106   :  { %3350 = vst [vmem:[#allocation36_spill] sm:$0xff] %v2719_v11  ;;  %v595_v36 = vadd.f32 %v594_v12, %v2622_v47  ;;  %v763_v34 = vpop.f32.mrf.mxu3  ;;  %v2728_v12 = vpack.c.bf16 %v133_v54, %v131_v60  ;;  %v1161_v60 = vmax.f32 %v669_v59, 0.0  ;;  %v135_v11 = vld [vmem:[#allocation3 + $0x1e0] sm:$0xff] }
 0x107   :  { %v501_v6 = vpop.f32.mrf.mxu0 }
 0x108   :  { %v764_v49 = vadd.f32 %v763_v34, %v595_v36  ;;  %v502_v33 = vadd.f32 %v501_v6, %v2622_v47 }
 0x10a   :  { %v1237_v36 = vmax.f32 %v764_v49, 0.0 }
 0x10b   :  { %707 = vmatmul.bf16.gmra.mxu1 %v2725_v25  ;;  %v670_v1 = vpop.f32.mrf.mxu1 }
 0x10c   :  { %v671_v24 = vadd.f32 %v670_v1, %v502_v33 }
 0x10d   :  { %v596_v35 = vpop.f32.mrf.mxu2 }
 0x10e   :  { %v597_v29 = vadd.f32 %v596_v35, %v2622_v47  ;;  %v765_v10 = vpop.f32.mrf.mxu3  ;;  %v1163_v35 = vmax.f32 %v671_v24, 0.0 }
 0x10f   :  { %v504_v48 = vpop.f32.mrf.mxu0 }
 0x110   :  { %v766_v9 = vadd.f32 %v765_v10, %v597_v29  ;;  %v505_v49 = vadd.f32 %v504_v48, %v2622_v47  ;;  %v2739_v10 = vpack.c.bf16 %v1163_v35, %v1161_v60 }
 0x112   :  { %v1239_v34 = vmax.f32 %v766_v9, 0.0  ;;  %543 = vmatmul.bf16.gmra.mxu0 %v2728_v12  ;;  %816 = vmatmul.bf16.gmra.mxu2 %v2529_v2  ;;  %v2302_v9 = vld [vmem:[#allocation8 + $0x38] sm:$0xff] }
 0x113   :  { %985 = vmatmul.bf16.gmra.mxu3 %v2538_v7  ;;  %v2310_v2 = vld [vmem:[#allocation8 + $0x78] sm:$0xff]  ;;  %v137_v7 = vld [vmem:[#allocation3 + $0x1f0] sm:$0xff]  ;;  %1465 = vmatpush.bf16.msrb.mxu0 %v2302_v9  ;;  %v673_v33 = vpop.f32.mrf.mxu1 }
 0x114   :  { %v2735_v0 = vpack.c.bf16 %v1239_v34, %v1237_v36  ;;  %1634 = vmatpush.bf16.msrb.mxu1 %v2310_v2  ;;  %v132_v36 = vld [vmem:[#allocation3 + $0x1c8] sm:$0xff]  ;;  %v134_v34 = vld [vmem:[#allocation3 + $0x1d8] sm:$0xff]  ;;  %v674_v1 = vadd.f32 %v673_v33, %v505_v49 }
 0x115   :  { %v599_v42 = vpop.f32.mrf.mxu2 }
 0x116   :  { %3351 = vst [vmem:[#allocation37_spill] sm:$0xff] %v2735_v0  ;;  %v600_v54 = vadd.f32 %v599_v42, %v2622_v47  ;;  %v768_v62 = vpop.f32.mrf.mxu3  ;;  %v2741_v42 = vpack.c.bf16 %v134_v34, %v132_v36 }
 0x117   :  { %v506_v6 = vpop.f32.mrf.mxu0 }
 0x118   :  { %v769_v29 = vadd.f32 %v768_v62, %v600_v54  ;;  %v2744_v62 = vpack.c.bf16 %v137_v7, %v135_v11  ;;  %v507_v35 = vadd.f32 %v506_v6, %v2622_v47  ;;  %v1165_v11 = vmax.f32 %v674_v1, 0.0  ;;  %v138_v1 = vld [vmem:[#allocation3 + $0x1f8] sm:$0xff] }
 0x11a   :  { %v1241_v9 = vmax.f32 %v769_v29, 0.0 }
 0x11b   :  { %712 = vmatmul.bf16.gmra.mxu1 %v2741_v42  ;;  %v675_v49 = vpop.f32.mrf.mxu1 }
 0x11c   :  { %v676_v7 = vadd.f32 %v675_v49, %v507_v35 }
 0x11d   :  { %v601_v59 = vpop.f32.mrf.mxu2 }
 0x11e   :  { %v602_v24 = vadd.f32 %v601_v59, %v2622_v47  ;;  %v770_v54 = vpop.f32.mrf.mxu3  ;;  %v1167_v6 = vmax.f32 %v676_v7, 0.0 }
 0x11f   :  { %v509_v48 = vpop.f32.mrf.mxu0 }
 0x120   :  { %v771_v60 = vadd.f32 %v770_v54, %v602_v24  ;;  %v2301_v24 = vld [vmem:[#allocation8 + $0x30] sm:$0xff]  ;;  %v2755_v0 = vpack.c.bf16 %v1167_v6, %v1165_v11 }
 0x121   :  { %1466 = vmatpush.bf16.msrb.mxu0 %v2301_v24 }
 0x122   :  { %v1243_v2 = vmax.f32 %v771_v60, 0.0  ;;  %548 = vmatmul.bf16.gmra.mxu0 %v2744_v62  ;;  %821 = vmatmul.bf16.gmra.mxu2 %v2541_v14  ;;  %v510_v60 = vadd.f32 %v509_v48, %v2622_v47  ;;  %v2300_v14 = vld [vmem:[#allocation8 + $0x28] sm:$0xff] }
 0x123   :  { %990 = vmatmul.bf16.gmra.mxu3 %v2550_v19  ;;  %v139_v19 = vld [vmem:[#allocation3 + $0x200] sm:$0xff] }
 0x124   :  { %v2751_v33 = vpack.c.bf16 %v1243_v2, %v1241_v9  ;;  %v678_v9 = vpop.f32.mrf.mxu1  ;;  %v136_v2 = vld [vmem:[#allocation3 + $0x1e8] sm:$0xff] }
 0x125   :  { %v604_v36 = vpop.f32.mrf.mxu2  ;;  %1467 = vmatpush.bf16.msrb.mxu0 %v2300_v14  ;;  %v679_v49 = vadd.f32 %v678_v9, %v510_v60  ;;  %v2298_v60 = vld [vmem:[#allocation8 + $0x18] sm:$0xff] }
 0x126   :  { %3352 = vst [vmem:[#allocation38_spill] sm:$0xff] %v2751_v33  ;;  %v605_v34 = vadd.f32 %v604_v36, %v2622_v47  ;;  %v773_v59 = vpop.f32.mrf.mxu3  ;;  %v2757_v36 = vpack.c.bf16 %v138_v1, %v136_v2 }
 0x127   :  { %v511_v54 = vpop.f32.mrf.mxu0  ;;  %v1169_v2 = vmax.f32 %v679_v49, 0.0  ;;  %v142_v49 = vld [vmem:[#allocation3 + $0x218] sm:$0xff] }
 0x128   :  { %v774_v29 = vadd.f32 %v773_v59, %v605_v34  ;;  %v2760_v34 = vpack.c.bf16 %v141_v52, %v139_v19  ;;  %v2299_v59 = vld [vmem:[#allocation8 + $0x20] sm:$0xff]  ;;  %v512_v24 = vadd.f32 %v511_v54, %v2622_v47  ;;  %v2297_v54 = vld [vmem:[#allocation8 + $0x10] sm:$0xff] }
 0x129   :  { %1468 = vmatpush.bf16.msrb.mxu0 %v2299_v59 }
 0x12a   :  { %v1245_v6 = vmax.f32 %v774_v29, 0.0 }
 0x12b   :  { %717 = vmatmul.bf16.gmra.mxu1 %v2757_v36 }
 0x12c   :  { %v680_v9 = vpop.f32.mrf.mxu1 }
 0x12d   :  { %v606_v35 = vpop.f32.mrf.mxu2  ;;  %1469 = vmatpush.bf16.msrb.mxu0 %v2298_v60  ;;  %v681_v1 = vadd.f32 %v680_v9, %v512_v24  ;;  %v145_v60 = vld [vmem:[#allocation3 + $0x230] sm:$0xff] }
 0x12e   :  { %v607_v33 = vadd.f32 %v606_v35, %v2622_v47  ;;  %v775_v7 = vpop.f32.mrf.mxu3 }
 0x12f   :  { %v514_v48 = vpop.f32.mrf.mxu0 }
 0x130   :  { %v776_v11 = vadd.f32 %v775_v7, %v607_v33  ;;  %v1171_v7 = vmax.f32 %v681_v1, 0.0 }
 0x131   :  { %1470 = vmatpush.bf16.msrb.mxu0 %v2297_v54 }
 0x132   :  { %v1247_v14 = vmax.f32 %v776_v11, 0.0  ;;  %553 = vmatmul.bf16.gmra.mxu0 %v2760_v34  ;;  %826 = vmatmul.bf16.gmra.mxu2 %v2553_v26  ;;  %v515_v26 = vadd.f32 %v514_v48, %v2622_v47  ;;  %v2771_v11 = vpack.c.bf16 %v1171_v7, %v1169_v2 }
 0x133   :  { %995 = vmatmul.bf16.gmra.mxu3 %v2562_v31  ;;  %v2296_v31 = vld [vmem:[#allocation8 + $0x8] sm:$0xff] }
 0x134   :  { %v2767_v52 = vpack.c.bf16 %v1247_v14, %v1245_v6  ;;  %v683_v6 = vpop.f32.mrf.mxu1  ;;  %v140_v14 = vld [vmem:[#allocation3 + $0x208] sm:$0xff] }
 0x135   :  { %v609_v19 = vpop.f32.mrf.mxu2  ;;  %1471 = vmatpush.bf16.msrb.mxu0 %v2296_v31  ;;  %v684_v9 = vadd.f32 %v683_v6, %v515_v26  ;;  %v2309_v26 = vld [vmem:[#allocation8 + $0x70] sm:$0xff] }
 0x136   :  { %3353 = vst [vmem:[#allocation39_spill] sm:$0xff] %v2767_v52  ;;  %v610_v33 = vadd.f32 %v609_v19, %v2622_v47  ;;  %v778_v35 = vpop.f32.mrf.mxu3  ;;  %v2773_v19 = vpack.c.bf16 %v142_v49, %v140_v14  ;;  %1635 = vmatpush.bf16.msrb.mxu1 %v2309_v26  ;;  %v144_v26 = vld [vmem:[#allocation3 + $0x228] sm:$0xff] }
 0x137   :  { %v516_v29 = vpop.f32.mrf.mxu0  ;;  %v1173_v14 = vmax.f32 %v684_v9, 0.0 }
 0x138   :  { %v779_v59 = vadd.f32 %v778_v35, %v610_v33  ;;  %v2776_v33 = vpack.c.bf16 %v145_v60, %v143_v51  ;;  %v2295_v35 = vld [vmem:[#allocation8] sm:$0xff]  ;;  %v517_v54 = vadd.f32 %v516_v29, %v2622_v47 }
 0x139   :  { %1472 = vmatpush.bf16.msrb.mxu0 %v2295_v35 }
 0x13a   :  { %v1249_v7 = vmax.f32 %v779_v59, 0.0 }
 0x13b   :  { %722 = vmatmul.bf16.gmra.mxu1 %v2773_v19 }
 0x13c   :  { %v685_v51 = vpop.f32.mrf.mxu1 }
 0x13d   :  { %v611_v24 = vpop.f32.mrf.mxu2  ;;  %v686_v49 = vadd.f32 %v685_v51, %v517_v54 }
 0x13e   :  { %v612_v52 = vadd.f32 %v611_v24, %v2622_v47  ;;  %v780_v1 = vpop.f32.mrf.mxu3 }
 0x13f   :  { %v519_v48 = vpop.f32.mrf.mxu0  ;;  %v1175_v59 = vmax.f32 %v686_v49, 0.0 }
 0x140   :  { %v781_v2 = vadd.f32 %v780_v1, %v612_v52  ;;  %v520_v35 = vadd.f32 %v519_v48, %v2622_v47 }
 0x142   :  { %v1251_v31 = vmax.f32 %v781_v2, 0.0  ;;  %558 = vmatmul.bf16.gmra.mxu0 %v2776_v33  ;;  %831 = vmatmul.bf16.gmra.mxu2 %v2565_v38  ;;  %v2787_v2 = vpack.c.bf16 %v1175_v59, %v1173_v14  ;;  %v147_v38 = vld [vmem:[#allocation3 + $0x240] sm:$0xff] }
 0x143   :  { %1000 = vmatmul.bf16.gmra.mxu3 %v2574_v43  ;;  %v2792_v51 = vpack.c.bf16 %v149_v40, %v147_v38 }
 0x144   :  { %v2783_v60 = vpack.c.bf16 %v1251_v31, %v1249_v7 }
 0x145   :  { %v614_v6 = vpop.f32.mrf.mxu2 }
 0x146   :  { %3354 = vst [vmem:[#allocation40_spill] sm:$0xff] %v2783_v60  ;;  %v615_v52 = vadd.f32 %v614_v6, %v2622_v47  ;;  %v783_v24 = vpop.f32.mrf.mxu3  ;;  %v2789_v60 = vpack.c.bf16 %v146_v39, %v144_v26 }
 0x147   :  { %v521_v29 = vpop.f32.mrf.mxu0 }
 0x148   :  { %v784_v1 = vadd.f32 %v783_v24, %v615_v52  ;;  %v688_v43 = vpop.f32.mrf.mxu1  ;;  %v522_v14 = vadd.f32 %v521_v29, %v2622_v47 }
 0x149   :  { %v689_v31 = vadd.f32 %v688_v43, %v520_v35 }
 0x14a   :  { %v1253_v49 = vmax.f32 %v784_v1, 0.0 }
 0x14b   :  { %727 = vmatmul.bf16.gmra.mxu1 %v2789_v60  ;;  %v1177_v40 = vmax.f32 %v689_v31, 0.0 }
 0x14d   :  { %v616_v7 = vpop.f32.mrf.mxu2 }
 0x14e   :  { %v617_v9 = vadd.f32 %v616_v7, %v2622_v47  ;;  %v785_v54 = vpop.f32.mrf.mxu3 }
 0x14f   :  { %v524_v6 = vpop.f32.mrf.mxu0 }
 0x150   :  { %v786_v48 = vadd.f32 %v785_v54, %v617_v9  ;;  %v690_v39 = vpop.f32.mrf.mxu1  ;;  %v525_v1 = vadd.f32 %v524_v6, %v2622_v47 }
 0x151   :  { %v691_v35 = vadd.f32 %v690_v39, %v522_v14 }
 0x152   :  { %v1255_v52 = vmax.f32 %v786_v48, 0.0  ;;  %563 = vmatmul.bf16.gmra.mxu0 %v2792_v51  ;;  %836 = vmatmul.bf16.gmra.mxu2 %v2577_v50  ;;  %v148_v50 = vld [vmem:[#allocation3 + $0x248] sm:$0xff]  ;;  %v150_v48 = vld [vmem:[#allocation3 + $0x258] sm:$0xff] }
 0x153   :  { %1005 = vmatmul.bf16.gmra.mxu3 %v2586_v58  ;;  %v1179_v7 = vmax.f32 %v691_v35, 0.0 }
 0x154   :  { %v2799_v24 = vpack.c.bf16 %v1255_v52, %v1253_v49  ;;  %v2805_v49 = vpack.c.bf16 %v150_v48, %v148_v50  ;;  %v2308_v52 = vld [vmem:[#allocation8 + $0x68] sm:$0xff] }
 0x155   :  { %v619_v59 = vpop.f32.mrf.mxu2  ;;  %v2803_v9 = vpack.c.bf16 %v1179_v7, %v1177_v40  ;;  %1636 = vmatpush.bf16.msrb.mxu1 %v2308_v52 }
 0x156   :  { %v620_v38 = vadd.f32 %v619_v59, %v2622_v47  ;;  %v788_v43 = vpop.f32.mrf.mxu3 }
 0x157   :  { %v526_v26 = vpop.f32.mrf.mxu0 }
 0x158   :  { %v789_v29 = vadd.f32 %v788_v43, %v620_v38  ;;  %v693_v54 = vpop.f32.mrf.mxu1  ;;  %v527_v6 = vadd.f32 %v526_v26, %v2622_v47  ;;  %v2307_v38 = vld [vmem:[#allocation8 + $0x60] sm:$0xff]  ;;  %v2306_v26 = vld [vmem:[#allocation8 + $0x58] sm:$0xff] }
 0x159   :  { %v694_v28 = vadd.f32 %v693_v54, %v525_v1  ;;  %1637 = vmatpush.bf16.msrb.mxu1 %v2307_v38 }
 0x15a   :  { %v1257_v40 = vmax.f32 %v789_v29, 0.0 }
 0x15b   :  { %732 = vmatmul.bf16.gmra.mxu1 %v2805_v49  ;;  %v1181_v54 = vmax.f32 %v694_v28, 0.0 }
 0x15d   :  { %v621_v58 = vpop.f32.mrf.mxu2  ;;  %1638 = vmatpush.bf16.msrb.mxu1 %v2306_v26 }
 0x15e   :  { %v622_v31 = vadd.f32 %v621_v58, %v2622_v47  ;;  %v790_v14 = vpop.f32.mrf.mxu3 }
 0x15f   :  { %v529_v39 = vpop.f32.mrf.mxu0 }
 0x160   :  { %v791_v59 = vadd.f32 %v790_v14, %v622_v31  ;;  %v695_v43 = vpop.f32.mrf.mxu1 }
 0x161   :  { %v696_v50 = vadd.f32 %v695_v43, %v527_v6 }
 0x162   :  { %v1259_v35 = vmax.f32 %v791_v59, 0.0  ;;  %841 = vmatmul.bf16.gmra.mxu2 %v2589_v5  ;;  %1473 = vmatmul.bf16.vlgmr.msrb.gmra.mxu0 %v2647_v53  ;;  %v530_v5 = vadd.f32 %v529_v39, %v2622_v47  ;;  %v2303_v39 = vld [vmem:[#allocation8 + $0x40] sm:$0xff] }
 0x163   :  { %1010 = vmatmul.bf16.gmra.mxu3 %v2598_v21  ;;  %v1183_v31 = vmax.f32 %v696_v50, 0.0  ;;  %v2305_v21 = vld [vmem:[#allocation8 + $0x50] sm:$0xff] }
 0x164   :  { %v2813_v7 = vpack.c.bf16 %v1259_v35, %v1257_v40  ;;  %1639 = vmatpush.bf16.msrb.mxu1 %v2305_v21  ;;  %v2304_v35 = vld [vmem:[#allocation8 + $0x48] sm:$0xff] }
 0x165   :  { %v624_v1 = vpop.f32.mrf.mxu2  ;;  %v2817_v53 = vpack.c.bf16 %v1183_v31, %v1181_v54 }
 0x166   :  { %v625_v48 = vadd.f32 %v624_v1, %v2622_v47  ;;  %v793_v58 = vpop.f32.mrf.mxu3 }
 0x167   :  { %v531_v29 = vpop.f32.mrf.mxu0 }
 0x168   :  { %v794_v14 = vadd.f32 %v793_v58, %v625_v48  ;;  %v698_v52 = vpop.f32.mrf.mxu1  ;;  %1640 = vmatpush.bf16.msrb.mxu1 %v2304_v35  ;;  %v532_v1 = vadd.f32 %v531_v29, %v2622_v47 }
 0x169   :  { %v699_v40 = vadd.f32 %v698_v52, %v530_v5 }
 0x16a   :  { %v1261_v50 = vmax.f32 %v794_v14, 0.0 }
 0x16b   :  { %v1185_v31 = vmax.f32 %v699_v40, 0.0 }
 0x16c   :  { %1641 = vmatpush.bf16.msrb.mxu1 %v2303_v39 }
 0x16d   :  { %v626_v59 = vpop.f32.mrf.mxu2 }
 0x16e   :  { %v627_v28 = vadd.f32 %v626_v59, %v2622_v47  ;;  %v795_v6 = vpop.f32.mrf.mxu3 }
 0x16f   :  { %v534_v38 = vpop.f32.mrf.mxu0 }
 0x170   :  { %v796_v43 = vadd.f32 %v795_v6, %v627_v28  ;;  %v700_v54 = vpop.f32.mrf.mxu1 }
 0x171   :  { %v701_v5 = vadd.f32 %v700_v54, %v532_v1 }
 0x172   :  { %v1263_v48 = vmax.f32 %v796_v43, 0.0  ;;  %846 = vmatmul.bf16.gmra.mxu2 %v2600_v22  ;;  %1478 = vmatmul.bf16.gmra.mxu0 %v2667_v63  ;;  %v535_v22 = vadd.f32 %v534_v38, %v2622_v47 }
 0x173   :  { %1015 = vmatmul.bf16.gmra.mxu3 %v2610_v37  ;;  %v1187_v14 = vmax.f32 %v701_v5, 0.0 }
 0x174   :  { %v2824_v58 = vpack.c.bf16 %v1263_v48, %v1261_v50 }
 0x175   :  { %v629_v26 = vpop.f32.mrf.mxu2  ;;  %v2828_v28 = vpack.c.bf16 %v1187_v14, %v1185_v31 }
 0x176   :  { %v630_v21 = vadd.f32 %v629_v26, %v2622_v47  ;;  %v798_v52 = vpop.f32.mrf.mxu3 }
 0x177   :  { %v536_v29 = vpop.f32.mrf.mxu0 }
 0x178   :  { %v799_v59 = vadd.f32 %v798_v52, %v630_v21  ;;  %v703_v63 = vpop.f32.mrf.mxu1  ;;  %v537_v40 = vadd.f32 %v536_v29, %v2622_v47  ;;  %v2354_v21 = vld [vmem:[%s3302_s2] sm:$0x3] }
 0x179   :  { %v704_v37 = vadd.f32 %v703_v63, %v535_v22  ;;  %v2840_v52 = vperm.slane %v2354_v21, 1 }
 0x17a   :  { %v1265_v1 = vmax.f32 %v799_v59, 0.0 }
 0x17b   :  { %v1189_v31 = vmax.f32 %v704_v37, 0.0 }
 0x17d   :  { %v631_v6 = vpop.f32.mrf.mxu2 }
 0x17e   :  { %v632_v35 = vadd.f32 %v631_v6, %v2622_v47  ;;  %v800_v43 = vpop.f32.mrf.mxu3 }
 0x17f   :  { %v539_v50 = vpop.f32.mrf.mxu0 }
 0x180   :  { %v801_v48 = vadd.f32 %v800_v43, %v632_v35  ;;  %v705_v38 = vpop.f32.mrf.mxu1 }
 0x181   :  { %v706_v5 = vadd.f32 %v705_v38, %v537_v40 }
 0x182   :  { %v1267_v39 = vmax.f32 %v801_v48, 0.0  ;;  %851 = vmatmul.bf16.gmra.mxu2 %v2612_v41  ;;  %1483 = vmatmul.bf16.gmra.mxu0 %v2687_v13  ;;  %v540_v41 = vadd.f32 %v539_v50, %v2622_v47 }
 0x183   :  { %1020 = vmatmul.bf16.gmra.mxu3 %v2629_v20  ;;  %v1191_v59 = vmax.f32 %v706_v5, 0.0 }
 0x184   :  { %v2835_v54 = vpack.c.bf16 %v1267_v39, %v1265_v1 }
 0x185   :  { %v812_v26 = vpop.f32.mrf.mxu2  ;;  %v2843_v13 = vpack.c.bf16 %v1191_v59, %v1189_v31 }
 0x186   :  { %v981_v29 = vpop.f32.mrf.mxu3  ;;  %v813_v20 = vadd.f32 %v812_v26, %v2840_v52 }
 0x187   :  { %v541_v14 = vpop.f32.mrf.mxu0 }
 0x188   :  { %v708_v22 = vpop.f32.mrf.mxu1  ;;  %v982_v37 = vadd.f32 %v981_v29, %v813_v20  ;;  %v542_v1 = vadd.f32 %v541_v14, %v2622_v47 }
 0x189   :  { %v709_v6 = vadd.f32 %v708_v22, %v540_v41 }
 0x18a   :  { %v1142_v39 = vmax.f32 %v982_v37, 0.0 }
 0x18b   :  { %v1193_v5 = vmax.f32 %v709_v6, 0.0 }
 0x18d   :  { %v814_v63 = vpop.f32.mrf.mxu2 }
 0x18e   :  { %v815_v35 = vadd.f32 %v814_v63, %v2840_v52  ;;  %v983_v43 = vpop.f32.mrf.mxu3 }
 0x18f   :  { %v544_v48 = vpop.f32.mrf.mxu0 }
 0x190   :  { %v984_v40 = vadd.f32 %v983_v43, %v815_v35  ;;  %v710_v26 = vpop.f32.mrf.mxu1  ;;  %v545_v20 = vadd.f32 %v544_v48, %v2622_v47 }
 0x191   :  { %v711_v21 = vadd.f32 %v710_v26, %v542_v1 }
 0x192   :  { %v1144_v38 = vmax.f32 %v984_v40, 0.0  ;;  %856 = vmatmul.bf16.gmra.mxu2 %v2632_v30  ;;  %1488 = vmatmul.bf16.gmra.mxu0 %v2707_v23 }
 0x193   :  { %1025 = vmatmul.bf16.gmra.mxu3 %v2649_v18  ;;  %v1195_v41 = vmax.f32 %v711_v21, 0.0 }
 0x194   :  { %v1270_v50 = vpack.c.bf16 %v1144_v38, %v1142_v39 }
 0x195   :  { %v817_v31 = vpop.f32.mrf.mxu2  ;;  %v2852_v14 = vpack.c.bf16 %v1195_v41, %v1193_v5 }
 0x196   :  { %v986_v29 = vpop.f32.mrf.mxu3  ;;  %1642 = vmatmul.bf16.vlgmr.msrb.gmra.mxu1 %v1270_v50  ;;  %v818_v22 = vadd.f32 %v817_v31, %v2840_v52 }
 0x197   :  { %v546_v59 = vpop.f32.mrf.mxu0 }
 0x198   :  { %v713_v30 = vpop.f32.mrf.mxu1  ;;  %v987_v37 = vadd.f32 %v986_v29, %v818_v22  ;;  %v547_v40 = vadd.f32 %v546_v59, %v2622_v47 }
 0x199   :  { %v714_v23 = vadd.f32 %v713_v30, %v545_v20 }
 0x19a   :  { %v1146_v1 = vmax.f32 %v987_v37, 0.0 }
 0x19b   :  { %v1197_v26 = vmax.f32 %v714_v23, 0.0 }
 0x19d   :  { %v819_v63 = vpop.f32.mrf.mxu2 }
 0x19e   :  { %v820_v18 = vadd.f32 %v819_v63, %v2840_v52  ;;  %v988_v35 = vpop.f32.mrf.mxu3 }
 0x19f   :  { %v549_v43 = vpop.f32.mrf.mxu0 }
 0x1a0   :  { %v989_v6 = vadd.f32 %v988_v35, %v820_v18  ;;  %v715_v38 = vpop.f32.mrf.mxu1  ;;  %v550_v41 = vadd.f32 %v549_v43, %v2622_v47 }
 0x1a1   :  { %v716_v31 = vadd.f32 %v715_v38, %v547_v40 }
 0x1a2   :  { %v1148_v39 = vmax.f32 %v989_v6, 0.0  ;;  %861 = vmatmul.bf16.gmra.mxu2 %v2652_v45  ;;  %1493 = vmatmul.bf16.gmra.mxu0 %v2723_v57 }
 0x1a3   :  { %1030 = vmatmul.bf16.gmra.mxu3 %v2669_v44  ;;  %v1199_v29 = vmax.f32 %v716_v31, 0.0 }
 0x1a4   :  { %v1272_v48 = vpack.c.bf16 %v1148_v39, %v1146_v1 }
 0x1a5   :  { %v822_v50 = vpop.f32.mrf.mxu2  ;;  %v2861_v59 = vpack.c.bf16 %v1199_v29, %v1197_v26 }
 0x1a6   :  { %v991_v5 = vpop.f32.mrf.mxu3  ;;  %1647 = vmatmul.bf16.gmra.mxu1 %v1272_v48  ;;  %v823_v20 = vadd.f32 %v822_v50, %v2840_v52 }
 0x1a7   :  { %v551_v21 = vpop.f32.mrf.mxu0 }
 0x1a8   :  { %v718_v45 = vpop.f32.mrf.mxu1  ;;  %v992_v30 = vadd.f32 %v991_v5, %v823_v20  ;;  %v552_v18 = vadd.f32 %v551_v21, %v2622_v47 }
 0x1a9   :  { %v719_v57 = vadd.f32 %v718_v45, %v550_v41 }
 0x1aa   :  { %v1150_v35 = vmax.f32 %v992_v30, 0.0 }
 0x1ab   :  { %v1201_v39 = vmax.f32 %v719_v57, 0.0 }
 0x1ad   :  { %v824_v22 = vpop.f32.mrf.mxu2 }
 0x1ae   :  { %v825_v44 = vadd.f32 %v824_v22, %v2840_v52  ;;  %v993_v63 = vpop.f32.mrf.mxu3 }
 0x1af   :  { %v554_v37 = vpop.f32.mrf.mxu0 }
 0x1b0   :  { %v994_v23 = vadd.f32 %v993_v63, %v825_v44  ;;  %v720_v40 = vpop.f32.mrf.mxu1  ;;  %v555_v31 = vadd.f32 %v554_v37, %v2622_v47 }
 0x1b1   :  { %v721_v48 = vadd.f32 %v720_v40, %v552_v18 }
 0x1b2   :  { %v1152_v6 = vmax.f32 %v994_v23, 0.0  ;;  %866 = vmatmul.bf16.gmra.mxu2 %v2672_v8  ;;  %1498 = vmatmul.bf16.gmra.mxu0 %v2739_v10 }
 0x1b3   :  { %1035 = vmatmul.bf16.gmra.mxu3 %v2689_v46  ;;  %v1203_v26 = vmax.f32 %v721_v48, 0.0 }
 0x1b4   :  { %v1274_v43 = vpack.c.bf16 %v1152_v6, %v1150_v35 }
 0x1b5   :  { %v827_v1 = vpop.f32.mrf.mxu2  ;;  %v2870_v5 = vpack.c.bf16 %v1203_v26, %v1201_v39 }
 0x1b6   :  { %v996_v38 = vpop.f32.mrf.mxu3  ;;  %1652 = vmatmul.bf16.gmra.mxu1 %v1274_v43  ;;  %v828_v21 = vadd.f32 %v827_v1, %v2840_v52 }
 0x1b7   :  { %v556_v50 = vpop.f32.mrf.mxu0 }
 0x1b8   :  { %v723_v8 = vpop.f32.mrf.mxu1  ;;  %v997_v41 = vadd.f32 %v996_v38, %v828_v21  ;;  %v557_v57 = vadd.f32 %v556_v50, %v2622_v47 }
 0x1b9   :  { %v724_v10 = vadd.f32 %v723_v8, %v555_v31 }
 0x1ba   :  { %v1154_v30 = vmax.f32 %v997_v41, 0.0 }
 0x1bb   :  { %v1205_v18 = vmax.f32 %v724_v10, 0.0 }
 0x1bd   :  { %v829_v29 = vpop.f32.mrf.mxu2 }
 0x1be   :  { %v830_v46 = vadd.f32 %v829_v29, %v2840_v52  ;;  %v998_v20 = vpop.f32.mrf.mxu3 }
 0x1bf   :  { %v559_v45 = vpop.f32.mrf.mxu0 }
 0x1c0   :  { %v999_v22 = vadd.f32 %v998_v20, %v830_v46  ;;  %v725_v37 = vpop.f32.mrf.mxu1  ;;  %v560_v1 = vadd.f32 %v559_v45, %v2622_v47 }
 0x1c1   :  { %v726_v35 = vadd.f32 %v725_v37, %v557_v57 }
 0x1c2   :  { %v1156_v44 = vmax.f32 %v999_v22, 0.0  ;;  %871 = vmatmul.bf16.gmra.mxu2 %v2692_v32  ;;  %1503 = vmatmul.bf16.gmra.mxu0 %v2755_v0 }
 0x1c3   :  { %1040 = vmatmul.bf16.gmra.mxu3 %v2709_v61  ;;  %v1207_v40 = vmax.f32 %v726_v35, 0.0 }
 0x1c4   :  { %v1276_v63 = vpack.c.bf16 %v1156_v44, %v1154_v30 }
 0x1c5   :  { %v832_v23 = vpop.f32.mrf.mxu2  ;;  %v2879_v39 = vpack.c.bf16 %v1207_v40, %v1205_v18 }
 0x1c6   :  { %v1001_v6 = vpop.f32.mrf.mxu3  ;;  %1657 = vmatmul.bf16.gmra.mxu1 %v1276_v63  ;;  %v833_v48 = vadd.f32 %v832_v23, %v2840_v52 }
 0x1c7   :  { %v561_v43 = vpop.f32.mrf.mxu0 }
 0x1c8   :  { %v728_v32 = vpop.f32.mrf.mxu1  ;;  %v1002_v50 = vadd.f32 %v1001_v6, %v833_v48  ;;  %v562_v8 = vadd.f32 %v561_v43, %v2622_v47 }
 0x1c9   :  { %v729_v0 = vadd.f32 %v728_v32, %v560_v1 }
 0x1ca   :  { %v1158_v29 = vmax.f32 %v1002_v50, 0.0 }
 0x1cb   :  { %v1209_v45 = vmax.f32 %v729_v0, 0.0 }
 0x1cd   :  { %v834_v38 = vpop.f32.mrf.mxu2 }
 0x1ce   :  { %v835_v61 = vadd.f32 %v834_v38, %v2840_v52  ;;  %v1003_v26 = vpop.f32.mrf.mxu3 }
 0x1cf   :  { %v564_v31 = vpop.f32.mrf.mxu0 }
 0x1d0   :  { %v1004_v21 = vadd.f32 %v1003_v26, %v835_v61  ;;  %v730_v46 = vpop.f32.mrf.mxu1  ;;  %v565_v63 = vadd.f32 %v564_v31, %v2622_v47 }
 0x1d1   :  { %v731_v22 = vadd.f32 %v730_v46, %v562_v8 }
 0x1d2   :  { %v1160_v10 = vmax.f32 %v1004_v21, 0.0  ;;  %876 = vmatmul.bf16.gmra.mxu2 %v2712_v17  ;;  %1508 = vmatmul.bf16.gmra.mxu0 %v2771_v11 }
 0x1d3   :  { %1045 = vmatmul.bf16.gmra.mxu3 %v2725_v25  ;;  %v1211_v44 = vmax.f32 %v731_v22, 0.0 }
 0x1d4   :  { %v1278_v41 = vpack.c.bf16 %v1160_v10, %v1158_v29 }
 0x1d5   :  { %v837_v20 = vpop.f32.mrf.mxu2  ;;  %v2888_v37 = vpack.c.bf16 %v1211_v44, %v1209_v45 }
 0x1d6   :  { %v1006_v57 = vpop.f32.mrf.mxu3  ;;  %1662 = vmatmul.bf16.gmra.mxu1 %v1278_v41  ;;  %v838_v23 = vadd.f32 %v837_v20, %v2840_v52 }
 0x1d7   :  { %v566_v30 = vpop.f32.mrf.mxu0 }
 0x1d8   :  { %v733_v17 = vpop.f32.mrf.mxu1  ;;  %v1007_v35 = vadd.f32 %v1006_v57, %v838_v23  ;;  %v567_v1 = vadd.f32 %v566_v30, %v2622_v47 }
 0x1d9   :  { %v734_v11 = vadd.f32 %v733_v17, %v565_v63 }
 0x1da   :  { %v1162_v48 = vmax.f32 %v1007_v35, 0.0 }
 0x1db   :  { %v1213_v61 = vmax.f32 %v734_v11, 0.0 }
 0x1dd   :  { %v839_v18 = vpop.f32.mrf.mxu2 }
 0x1de   :  { %v840_v25 = vadd.f32 %v839_v18, %v2840_v52  ;;  %v1008_v6 = vpop.f32.mrf.mxu3 }
 0x1df   :  { %v1474_v43 = vpop.f32.mrf.mxu0 }
 0x1e0   :  { %v1009_v40 = vadd.f32 %v1008_v6, %v840_v25  ;;  %v735_v0 = vpop.f32.mrf.mxu1 }
 0x1e1   :  { %v736_v26 = vadd.f32 %v735_v0, %v567_v1 }
 0x1e2   :  { %v1164_v32 = vmax.f32 %v1009_v40, 0.0  ;;  %881 = vmatmul.bf16.gmra.mxu2 %v2728_v12  ;;  %1513 = vmatmul.bf16.gmra.mxu0 %v2787_v2 }
 0x1e3   :  { %1050 = vmatmul.bf16.gmra.mxu3 %v2741_v42  ;;  %v1215_v8 = vmax.f32 %v736_v26, 0.0 }
 0x1e4   :  { %v1280_v38 = vpack.c.bf16 %v1164_v32, %v1162_v48 }
 0x1e5   :  { %v842_v50 = vpop.f32.mrf.mxu2  ;;  %v2896_v29 = vpack.c.bf16 %v1215_v8, %v1213_v61 }
 0x1e6   :  { %v1011_v31 = vpop.f32.mrf.mxu3  ;;  %1667 = vmatmul.bf16.gmra.mxu1 %v1280_v38  ;;  %v843_v47 = vadd.f32 %v842_v50, %v2840_v52  ;;  %v2920_v38 = vld [vmem:[%s3304_s4] ss:$0 sm:$0xff] }
 0x1e7   :  { %v1476_v21 = vpop.f32.mrf.mxu0  ;;  %v1475_v61 = vadd.f32 %v2920_v38, %v1474_v43 }
 0x1e8   :  { %v1012_v41 = vadd.f32 %v1011_v31, %v843_v47 }
 0x1ea   :  { %v1166_v20 = vmax.f32 %v1012_v41, 0.0 }
 0x1ed   :  { %v844_v10 = vpop.f32.mrf.mxu2 }
 0x1ee   :  { %v845_v12 = vadd.f32 %v844_v10, %v2840_v52  ;;  %v1013_v2 = vpop.f32.mrf.mxu3 }
 0x1ef   :  { %v2900_v46 = vpop.f32.mrf.mxu0 }
 0x1f0   :  { %v1014_v42 = vadd.f32 %v1013_v2, %v845_v12 }
 0x1f2   :  { %v1168_v45 = vmax.f32 %v1014_v42, 0.0  ;;  %886 = vmatmul.bf16.gmra.mxu2 %v2744_v62  ;;  %1518 = vmatmul.bf16.gmra.mxu0 %v2803_v9  ;;  %v1477_v42 = vadd.f32 %v2920_v38, %v1476_v21 }
 0x1f3   :  { %1055 = vmatmul.bf16.gmra.mxu3 %v2757_v36 }
 0x1f4   :  { %v1282_v22 = vpack.c.bf16 %v1168_v45, %v1166_v20 }
 0x1f5   :  { %v847_v57 = vpop.f32.mrf.mxu2 }
 0x1f6   :  { %v1016_v30 = vpop.f32.mrf.mxu3  ;;  %1672 = vmatmul.bf16.gmra.mxu1 %v1282_v22  ;;  %v848_v63 = vadd.f32 %v847_v57, %v2840_v52 }
 0x1f7   :  { %v2905_v44 = vpop.f32.mrf.mxu0 }
 0x1f8   :  { %v1017_v17 = vadd.f32 %v1016_v30, %v848_v63 }
 0x1fa   :  { %v1170_v25 = vmax.f32 %v1017_v17, 0.0 }
 0x1fd   :  { %v849_v23 = vpop.f32.mrf.mxu2 }
 0x1fe   :  { %v850_v18 = vadd.f32 %v849_v23, %v2840_v52  ;;  %v1018_v11 = vpop.f32.mrf.mxu3 }
 0x1ff   :  { %v2909_v35 = vpop.f32.mrf.mxu0 }
 0x200   :  { %v1019_v62 = vadd.f32 %v1018_v11, %v850_v18  ;;  %v1480_v18 = vadd.f32 %v2920_v38, %v2900_v46 }
 0x202   :  { %v1172_v9 = vmax.f32 %v1019_v62, 0.0  ;;  %891 = vmatmul.bf16.gmra.mxu2 %v2760_v34  ;;  %1523 = vmatmul.bf16.gmra.mxu0 %v2817_v53 }
 0x203   :  { %1060 = vmatmul.bf16.gmra.mxu3 %v2773_v19 }
 0x204   :  { %v1284_v36 = vpack.c.bf16 %v1172_v9, %v1170_v25 }
 0x205   :  { %v852_v6 = vpop.f32.mrf.mxu2 }
 0x206   :  { %v1021_v40 = vpop.f32.mrf.mxu3  ;;  %1677 = vmatmul.bf16.gmra.mxu1 %v1284_v36  ;;  %v853_v48 = vadd.f32 %v852_v6, %v2840_v52 }
 0x207   :  { %v2914_v1 = vpop.f32.mrf.mxu0 }
 0x208   :  { %v1022_v0 = vadd.f32 %v1021_v40, %v853_v48  ;;  %v1482_v48 = vadd.f32 %v2920_v38, %v2905_v44 }
 0x20a   :  { %v1174_v26 = vmax.f32 %v1022_v0, 0.0 }
 0x20d   :  { %v854_v32 = vpop.f32.mrf.mxu2 }
 0x20e   :  { %v855_v34 = vadd.f32 %v854_v32, %v2840_v52  ;;  %v1023_v53 = vpop.f32.mrf.mxu3 }
 0x20f   :  { %v2923_v50 = vpop.f32.mrf.mxu0 }
 0x210   :  { %v1024_v19 = vadd.f32 %v1023_v53, %v855_v34 }
 0x212   :  { %v1176_v31 = vmax.f32 %v1024_v19, 0.0  ;;  %896 = vmatmul.bf16.gmra.mxu2 %v2776_v33  ;;  %1528 = vmatmul.bf16.gmra.mxu0 %v2828_v28 }
 0x213   :  { %v1643_v8 = vpop.f32.mrf.mxu1  ;;  %1065 = vmatmul.bf16.gmra.mxu3 %v2789_v60 }
 0x214   :  { %v1644_v47 = vadd.f32 %v1643_v8, %v1475_v61  ;;  %v1286_v10 = vpack.c.bf16 %v1176_v31, %v1174_v26  ;;  %v1485_v8 = vadd.f32 %v2920_v38, %v2909_v35 }
 0x215   :  { %v857_v41 = vpop.f32.mrf.mxu2 }
 0x216   :  { %v1026_v12 = vpop.f32.mrf.mxu3  ;;  %1682 = vmatmul.bf16.gmra.mxu1 %v1286_v10  ;;  %v858_v43 = vadd.f32 %v857_v41, %v2840_v52  ;;  %v1803_v33 = vmax.f32 %v1644_v47, 0.0 }
 0x217   :  { %v2929_v2 = vpop.f32.mrf.mxu0 }
 0x218   :  { %v1027_v57 = vadd.f32 %v1026_v12, %v858_v43 }
 0x21a   :  { %v1178_v21 = vmax.f32 %v1027_v57, 0.0 }
 0x21b   :  { %v1645_v20 = vpop.f32.mrf.mxu1 }
 0x21c   :  { %v1646_v45 = vadd.f32 %v1645_v20, %v1477_v42 }
 0x21d   :  { %v859_v22 = vpop.f32.mrf.mxu2 }
 0x21e   :  { %v1804_v28 = vmax.f32 %v1646_v45, 0.0  ;;  %v860_v30 = vadd.f32 %v859_v22, %v2840_v52  ;;  %v1028_v60 = vpop.f32.mrf.mxu3  ;;  %v1487_v45 = vadd.f32 %v2920_v38, %v2914_v1 }
 0x21f   :  { %v2934_v63 = vpop.f32.mrf.mxu0 }
 0x220   :  { %v1029_v23 = vadd.f32 %v1028_v60, %v860_v30  ;;  %v2936_v17 = vpack.c.bf16 %v1804_v28, %v1803_v33 }
 0x222   :  { %v1180_v11 = vmax.f32 %v1029_v23, 0.0  ;;  %901 = vmatmul.bf16.gmra.mxu2 %v2792_v51  ;;  %1533 = vmatmul.bf16.gmra.mxu0 %v2843_v13 }
 0x223   :  { %v1648_v62 = vpop.f32.mrf.mxu1  ;;  %1070 = vmatmul.bf16.gmra.mxu3 %v2805_v49 }
 0x224   :  { %v1649_v25 = vadd.f32 %v1648_v62, %v1480_v18  ;;  %v1288_v9 = vpack.c.bf16 %v1180_v11, %v1178_v21  ;;  %v1490_v21 = vadd.f32 %v2920_v38, %v2923_v50 }
 0x225   :  { %v862_v36 = vpop.f32.mrf.mxu2 }
 0x226   :  { %v1031_v6 = vpop.f32.mrf.mxu3  ;;  %1687 = vmatmul.bf16.gmra.mxu1 %v1288_v9  ;;  %v863_v46 = vadd.f32 %v862_v36, %v2840_v52  ;;  %v1805_v34 = vmax.f32 %v1649_v25, 0.0 }
 0x227   :  { %v2943_v40 = vpop.f32.mrf.mxu0 }
 0x228   :  { %v1032_v13 = vadd.f32 %v1031_v6, %v863_v46  ;;  %v1492_v46 = vadd.f32 %v2920_v38, %v2929_v2 }
 0x22a   :  { %v1182_v44 = vmax.f32 %v1032_v13, 0.0 }
 0x22b   :  { %v1650_v32 = vpop.f32.mrf.mxu1 }
 0x22c   :  { %v1651_v0 = vadd.f32 %v1650_v32, %v1482_v48 }
 0x22d   :  { %v864_v51 = vpop.f32.mrf.mxu2 }
 0x22e   :  { %v1806_v53 = vmax.f32 %v1651_v0, 0.0  ;;  %v865_v49 = vadd.f32 %v864_v51, %v2840_v52  ;;  %v1033_v19 = vpop.f32.mrf.mxu3 }
 0x22f   :  { %v2949_v61 = vpop.f32.mrf.mxu0 }
 0x230   :  { %v1034_v26 = vadd.f32 %v1033_v19, %v865_v49  ;;  %v2951_v31 = vpack.c.bf16 %v1806_v53, %v1805_v34 }
 0x232   :  { %v1184_v47 = vmax.f32 %v1034_v26, 0.0  ;;  %906 = vmatmul.bf16.gmra.mxu2 %v2519_v55  ;;  %1538 = vmatmul.bf16.gmra.mxu0 %v2852_v14  ;;  %v1495_v26 = vadd.f32 %v2920_v38, %v2934_v63 }
 0x233   :  { %v1653_v10 = vpop.f32.mrf.mxu1  ;;  %1075 = vmatmul.bf16.gmra.mxu3 %v2521_v56 }
 0x234   :  { %v1654_v41 = vadd.f32 %v1653_v10, %v1485_v8  ;;  %v1290_v12 = vpack.c.bf16 %v1184_v47, %v1182_v44 }
 0x235   :  { %v867_v42 = vpop.f32.mrf.mxu2 }
 0x236   :  { %v1036_v43 = vpop.f32.mrf.mxu3  ;;  %1692 = vmatmul.bf16.gmra.mxu1 %v1290_v12  ;;  %v868_v35 = vadd.f32 %v867_v42, %v2840_v52  ;;  %v1807_v57 = vmax.f32 %v1654_v41, 0.0 }
 0x237   :  { %v2958_v20 = vpop.f32.mrf.mxu0 }
 0x238   :  { %v1037_v14 = vadd.f32 %v1036_v43, %v868_v35  ;;  %v1497_v43 = vadd.f32 %v2920_v38, %v2943_v40 }
 0x23a   :  { %v1186_v1 = vmax.f32 %v1037_v14, 0.0 }
 0x23b   :  { %v1655_v22 = vpop.f32.mrf.mxu1 }
 0x23c   :  { %v1656_v33 = vadd.f32 %v1655_v22, %v1487_v45 }
 0x23d   :  { %v869_v55 = vpop.f32.mrf.mxu2 }
 0x23e   :  { %v1808_v28 = vmax.f32 %v1656_v33, 0.0  ;;  %v870_v56 = vadd.f32 %v869_v55, %v2840_v52  ;;  %v1038_v30 = vpop.f32.mrf.mxu3 }
 0x23f   :  { %v2964_v60 = vpop.f32.mrf.mxu0 }
 0x240   :  { %v1039_v23 = vadd.f32 %v1038_v30, %v870_v56  ;;  %v2966_v18 = vpack.c.bf16 %v1808_v28, %v1807_v57 }
 0x242   :  { %v1188_v11 = vmax.f32 %v1039_v23, 0.0  ;;  %911 = vmatmul.bf16.gmra.mxu2 %v2531_v3  ;;  %1543 = vmatmul.bf16.gmra.mxu0 %v2861_v59  ;;  %v3355_v23 = vld [vmem:[#allocation13_spill] sm:$0xff] }
 0x243   :  { %v1658_v62 = vpop.f32.mrf.mxu1  ;;  %1080 = vmatmul.bf16.gmra.mxu3 %v2533_v4 }
 0x244   :  { %v1659_v25 = vadd.f32 %v1658_v62, %v1490_v21  ;;  %v1292_v9 = vpack.c.bf16 %v1188_v11, %v1186_v1 }
 0x245   :  { %v872_v36 = vpop.f32.mrf.mxu2 }
 0x246   :  { %v1041_v6 = vpop.f32.mrf.mxu3  ;;  %1697 = vmatmul.bf16.gmra.mxu1 %v1292_v9  ;;  %v873_v50 = vadd.f32 %v872_v36, %v2840_v52  ;;  %v1809_v51 = vmax.f32 %v1659_v25, 0.0 }
 0x247   :  { %v2973_v48 = vpop.f32.mrf.mxu0 }
 0x248   :  { %v1042_v59 = vadd.f32 %v1041_v6, %v873_v50 }
 0x24a   :  { %v1190_v2 = vmax.f32 %v1042_v59, 0.0  ;;  %v3357_v59 = vld [vmem:[#allocation15_spill] sm:$0xff] }
 0x24b   :  { %v1660_v32 = vpop.f32.mrf.mxu1 }
 0x24c   :  { %v1661_v0 = vadd.f32 %v1660_v32, %v1492_v46 }
 0x24d   :  { %v874_v3 = vpop.f32.mrf.mxu2 }
 0x24e   :  { %v1810_v34 = vmax.f32 %v1661_v0, 0.0  ;;  %v875_v4 = vadd.f32 %v874_v3, %v2840_v52  ;;  %v1043_v13 = vpop.f32.mrf.mxu3  ;;  %v3356_v3 = vld [vmem:[#allocation14_spill] sm:$0xff] }
 0x24f   :  { %v2979_v53 = vpop.f32.mrf.mxu0 }
 0x250   :  { %v1044_v49 = vadd.f32 %v1043_v13, %v875_v4  ;;  %v2981_v19 = vpack.c.bf16 %v1810_v34, %v1809_v51 }
 0x252   :  { %v1192_v8 = vmax.f32 %v1044_v49, 0.0  ;;  %916 = vmatmul.bf16.gmra.mxu2 %v2543_v15  ;;  %1548 = vmatmul.bf16.gmra.mxu0 %v2870_v5 }
 0x253   :  { %v1663_v44 = vpop.f32.mrf.mxu1  ;;  %1085 = vmatmul.bf16.gmra.mxu3 %v2545_v16 }
 0x254   :  { %v1664_v47 = vadd.f32 %v1663_v44, %v1495_v26  ;;  %v1294_v10 = vpack.c.bf16 %v1192_v8, %v1190_v2 }
 0x255   :  { %v877_v41 = vpop.f32.mrf.mxu2 }
 0x256   :  { %v1046_v12 = vpop.f32.mrf.mxu3  ;;  %1702 = vmatmul.bf16.gmra.mxu1 %v1294_v10  ;;  %v878_v63 = vadd.f32 %v877_v41, %v2840_v52  ;;  %v1811_v22 = vmax.f32 %v1664_v47, 0.0 }
 0x257   :  { %v2988_v42 = vpop.f32.mrf.mxu0 }
 0x258   :  { %v1047_v5 = vadd.f32 %v1046_v12, %v878_v63  ;;  %v3358_v63 = vld [vmem:[#allocation16_spill] sm:$0xff] }
 0x25a   :  { %v1194_v56 = vmax.f32 %v1047_v5, 0.0 }
 0x25b   :  { %v1665_v45 = vpop.f32.mrf.mxu1 }
 0x25c   :  { %v1666_v35 = vadd.f32 %v1665_v45, %v1497_v43 }
 0x25d   :  { %v879_v15 = vpop.f32.mrf.mxu2 }
 0x25e   :  { %v1812_v33 = vmax.f32 %v1666_v35, 0.0  ;;  %v880_v16 = vadd.f32 %v879_v15, %v2840_v52  ;;  %v1048_v55 = vpop.f32.mrf.mxu3  ;;  %v3359_v35 = vld [vmem:[#allocation17_spill] sm:$0xff] }
 0x25f   :  { %v2994_v57 = vpop.f32.mrf.mxu0 }
 0x260   :  { %v1049_v14 = vadd.f32 %v1048_v55, %v880_v16  ;;  %v2996_v28 = vpack.c.bf16 %v1812_v33, %v1811_v22  ;;  %v1510_v16 = vadd.f32 %v2920_v38, %v2979_v53  ;;  %v1512_v55 = vadd.f32 %v2920_v38, %v2988_v42 }
 0x261   :  { %v1505_v42 = vadd.f32 %v2920_v38, %v2964_v60 }
 0x262   :  { %v1196_v30 = vmax.f32 %v1049_v14, 0.0  ;;  %921 = vmatmul.bf16.gmra.mxu2 %v2555_v27  ;;  %1553 = vmatmul.bf16.gmra.mxu0 %v2879_v39 }
 0x263   :  { %v3000_v40 = vpop.f32.mrf.mxu1  ;;  %1090 = vmatmul.bf16.gmra.mxu3 %v3355_v23 }
 0x264   :  { %v1296_v21 = vpack.c.bf16 %v1196_v30, %v1194_v56 }
 0x265   :  { %v882_v1 = vpop.f32.mrf.mxu2 }
 0x266   :  { %v1051_v11 = vpop.f32.mrf.mxu3  ;;  %1707 = vmatmul.bf16.gmra.mxu1 %v1296_v21  ;;  %v883_v25 = vadd.f32 %v882_v1, %v2840_v52 }
 0x267   :  { %v3003_v62 = vpop.f32.mrf.mxu0 }
 0x268   :  { %v1052_v6 = vadd.f32 %v1051_v11, %v883_v25 }
 0x26a   :  { %v1198_v32 = vmax.f32 %v1052_v6, 0.0  ;;  %v1507_v6 = vadd.f32 %v2920_v38, %v2973_v48 }
 0x26b   :  { %v3006_v9 = vpop.f32.mrf.mxu1 }
 0x26d   :  { %v884_v36 = vpop.f32.mrf.mxu2 }
 0x26e   :  { %v885_v27 = vadd.f32 %v884_v36, %v2840_v52  ;;  %v1053_v46 = vpop.f32.mrf.mxu3 }
 0x26f   :  { %v3009_v39 = vpop.f32.mrf.mxu0 }
 0x270   :  { %v1054_v50 = vadd.f32 %v1053_v46, %v885_v27 }
 0x272   :  { %v1200_v0 = vmax.f32 %v1054_v50, 0.0  ;;  %926 = vmatmul.bf16.gmra.mxu2 %v3356_v3  ;;  %1558 = vmatmul.bf16.gmra.mxu0 %v2888_v37 }
 0x273   :  { %v1673_v51 = vpop.f32.mrf.mxu1  ;;  %1095 = vmatmul.bf16.gmra.mxu3 %v3357_v59  ;;  %v3360_v59 = vld [vmem:[#allocation18_spill] sm:$0xff] }
 0x274   :  { %v1298_v34 = vpack.c.bf16 %v1200_v0, %v1198_v32  ;;  %v1515_v32 = vadd.f32 %v2920_v38, %v2994_v57  ;;  %v1502_v57 = vadd.f32 %v2920_v38, %v2958_v20 }
 0x275   :  { %v887_v4 = vpop.f32.mrf.mxu2 }
 0x276   :  { %v1056_v13 = vpop.f32.mrf.mxu3  ;;  %1712 = vmatmul.bf16.gmra.mxu1 %v1298_v34  ;;  %v888_v26 = vadd.f32 %v887_v4, %v2840_v52  ;;  %v3361_v34 = vld [vmem:[#allocation26_spill] sm:$0xff]  ;;  %v1674_v4 = vadd.f32 %v1673_v51, %v1505_v42  ;;  %v1671_v51 = vadd.f32 %v3006_v9, %v1502_v57 }
 0x277   :  { %v3014_v49 = vpop.f32.mrf.mxu0 }
 0x278   :  { %v1057_v44 = vadd.f32 %v1056_v13, %v888_v26  ;;  %v3362_v13 = vld [vmem:[#allocation19_spill] sm:$0xff]  ;;  %v1814_v20 = vmax.f32 %v1671_v51, 0.0 }
 0x279   :  { %v3368_v51 = vld [vmem:[#allocation23_spill] sm:$0xff] }
 0x27a   :  { %v1202_v12 = vmax.f32 %v1057_v44, 0.0 }
 0x27b   :  { %v1675_v2 = vpop.f32.mrf.mxu1 }
 0x27c   :  { %v1676_v50 = vadd.f32 %v1675_v2, %v1507_v6  ;;  %v1815_v2 = vmax.f32 %v1674_v4, 0.0 }
 0x27d   :  { %v889_v8 = vpop.f32.mrf.mxu2 }
 0x27e   :  { %v890_v47 = vadd.f32 %v889_v8, %v2840_v52  ;;  %v1058_v10 = vpop.f32.mrf.mxu3  ;;  %v1816_v44 = vmax.f32 %v1676_v50, 0.0 }
 0x27f   :  { %v3018_v41 = vpop.f32.mrf.mxu0 }
 0x280   :  { %v1059_v37 = vadd.f32 %v1058_v10, %v890_v47 }
 0x282   :  { %v1204_v43 = vmax.f32 %v1059_v37, 0.0  ;;  %931 = vmatmul.bf16.gmra.mxu2 %v3358_v63  ;;  %1563 = vmatmul.bf16.gmra.mxu0 %v2896_v29  ;;  %v1500_v37 = vadd.f32 %v2920_v38, %v2949_v61 }
 0x283   :  { %v1678_v45 = vpop.f32.mrf.mxu1  ;;  %1100 = vmatmul.bf16.gmra.mxu3 %v3359_v35 }
 0x284   :  { %v1300_v15 = vpack.c.bf16 %v1204_v43, %v1202_v12  ;;  %v1679_v14 = vadd.f32 %v1678_v45, %v1510_v16  ;;  %v1873_v12 = vpack.c.bf16 %v1816_v44, %v1815_v2  ;;  %v1517_v43 = vadd.f32 %v2920_v38, %v3003_v62  ;;  %v3367_v2 = vld [vmem:[#allocation32_spill] sm:$0xff] }
 0x285   :  { %v892_v22 = vpop.f32.mrf.mxu2  ;;  %v1669_v45 = vadd.f32 %v3000_v40, %v1500_v37  ;;  %v1520_v40 = vadd.f32 %v2920_v38, %v3009_v39  ;;  %v1522_v39 = vadd.f32 %v2920_v38, %v3014_v49  ;;  %v1525_v49 = vadd.f32 %v2920_v38, %v3018_v41 }
 0x286   :  { %1717 = vmatmul.bf16.gmra.mxu1 %v1300_v15  ;;  %v1061_v5 = vpop.f32.mrf.mxu3  ;;  %v893_v56 = vadd.f32 %v892_v22, %v2840_v52  ;;  %v1817_v21 = vmax.f32 %v1679_v14, 0.0 }
 0x287   :  { %v3023_v33 = vpop.f32.mrf.mxu0  ;;  %v1813_v9 = vmax.f32 %v1669_v45, 0.0 }
 0x288   :  { %v1062_v1 = vadd.f32 %v1061_v5, %v893_v56  ;;  %v1527_v41 = vadd.f32 %v2920_v38, %v3023_v33 }
 0x28a   :  { %v1206_v0 = vmax.f32 %v1062_v1, 0.0  ;;  %v3363_v1 = vld [vmem:[#allocation20_spill] sm:$0xff] }
 0x28b   :  { %v1680_v30 = vpop.f32.mrf.mxu1 }
 0x28c   :  { %v1681_v29 = vadd.f32 %v1680_v30, %v1512_v55 }
 0x28d   :  { %v894_v23 = vpop.f32.mrf.mxu2 }
 0x28e   :  { %v1818_v11 = vmax.f32 %v1681_v29, 0.0  ;;  %v895_v25 = vadd.f32 %v894_v23, %v2840_v52  ;;  %v1063_v36 = vpop.f32.mrf.mxu3  ;;  %v1872_v29 = vpack.c.bf16 %v1814_v20, %v1813_v9 }
 0x28f   :  { %v3033_v27 = vpop.f32.mrf.mxu0 }
 0x290   :  { %v1874_v53 = vpack.c.bf16 %v1818_v11, %v1817_v21  ;;  %v1064_v46 = vadd.f32 %v1063_v36, %v895_v25  ;;  %v3364_v11 = vld [vmem:[#allocation29_spill] sm:$0xff]  ;;  %v1530_v33 = vadd.f32 %v2920_v38, %v3033_v27 }
 0x291   :  { %v3365_v36 = vld [vmem:[#allocation21_spill] sm:$0xff] }
 0x292   :  { %v1208_v3 = vmax.f32 %v1064_v46, 0.0  ;;  %936 = vmatmul.bf16.gmra.mxu2 %v3360_v59  ;;  %1568 = vmatmul.bf16.gmra.mxu0 %v3361_v34 }
 0x293   :  { %1902 = vmatpush.bf16.xpose.msra.mxu2 %v1874_v53  ;;  %v1683_v48 = vpop.f32.mrf.mxu1  ;;  %1105 = vmatmul.bf16.gmra.mxu3 %v3362_v13 }
 0x294   :  { %v1684_v26 = vadd.f32 %v1683_v48, %v1515_v32  ;;  %v1302_v8 = vpack.c.bf16 %v1208_v3, %v1206_v0 }
 0x295   :  { %v897_v47 = vpop.f32.mrf.mxu2 }
 0x296   :  { %1722 = vmatmul.bf16.gmra.mxu1 %v1302_v8  ;;  %v1066_v60 = vpop.f32.mrf.mxu3  ;;  %v898_v63 = vadd.f32 %v897_v47, %v2840_v52  ;;  %v1819_v5 = vmax.f32 %v1684_v26, 0.0 }
 0x297   :  { %v3044_v10 = vpop.f32.mrf.mxu0 }
 0x298   :  { %v1067_v16 = vadd.f32 %v1066_v60, %v898_v63  ;;  %v1532_v27 = vadd.f32 %v2920_v38, %v3044_v10 }
 0x29a   :  { %v1210_v23 = vmax.f32 %v1067_v16, 0.0 }
 0x29b   :  { %1903 = vmatpush.bf16.xpose.msra.mxu2 %v1873_v12  ;;  %v1685_v35 = vpop.f32.mrf.mxu1 }
 0x29c   :  { %v1686_v15 = vadd.f32 %v1685_v35, %v1517_v43 }
 0x29d   :  { %v899_v22 = vpop.f32.mrf.mxu2 }
 0x29e   :  { %v1820_v55 = vmax.f32 %v1686_v15, 0.0  ;;  %v900_v61 = vadd.f32 %v899_v22, %v2840_v52  ;;  %v1068_v14 = vpop.f32.mrf.mxu3 }
 0x29f   :  { %v3054_v56 = vpop.f32.mrf.mxu0 }
 0x2a0   :  { %v1069_v30 = vadd.f32 %v1068_v14, %v900_v61  ;;  %v3056_v62 = vpack.c.bf16 %v1820_v55, %v1819_v5  ;;  %v1535_v10 = vadd.f32 %v2920_v38, %v3054_v56 }
 0x2a2   :  { %v1212_v21 = vmax.f32 %v1069_v30, 0.0  ;;  %941 = vmatmul.bf16.gmra.mxu2 %v3363_v1  ;;  %1573 = vmatmul.bf16.gmra.mxu0 %v3364_v11  ;;  %v3371_v11 = vld [vmem:[#allocation25_spill] sm:$0xff] }
 0x2a3   :  { %1904 = vmatpush.bf16.xpose.msra.mxu2 %v1872_v29  ;;  %v1688_v25 = vpop.f32.mrf.mxu1  ;;  %1110 = vmatmul.bf16.gmra.mxu3 %v3365_v36 }
 0x2a4   :  { %v1689_v6 = vadd.f32 %v1688_v25, %v1520_v40  ;;  %v1304_v53 = vpack.c.bf16 %v1212_v21, %v1210_v23  ;;  %v3370_v21 = vld [vmem:[#allocation35_spill] sm:$0xff] }
 0x2a5   :  { %v902_v46 = vpop.f32.mrf.mxu2 }
 0x2a6   :  { %1727 = vmatmul.bf16.gmra.mxu1 %v1304_v53  ;;  %v1071_v42 = vpop.f32.mrf.mxu3  ;;  %v903_v32 = vadd.f32 %v902_v46, %v2840_v52  ;;  %v1821_v34 = vmax.f32 %v1689_v6, 0.0 }
 0x2a7   :  { %v3063_v50 = vpop.f32.mrf.mxu0 }
 0x2a8   :  { %v1072_v4 = vadd.f32 %v1071_v42, %v903_v32 }
 0x2aa   :  { %v1214_v60 = vmax.f32 %v1072_v4, 0.0 }
 0x2ab   :  { %1905 = vmatpush.bf16.xpose.msra.mxu2 %v2996_v28  ;;  %v1690_v0 = vpop.f32.mrf.mxu1  ;;  %v3366_v28 = vld [vmem:[#allocation22_spill] sm:$0xff] }
 0x2ac   :  { %v1691_v3 = vadd.f32 %v1690_v0, %v1522_v39 }
 0x2ad   :  { %v904_v59 = vpop.f32.mrf.mxu2 }
 0x2ae   :  { %v1822_v48 = vmax.f32 %v1691_v3, 0.0  ;;  %v905_v13 = vadd.f32 %v904_v59, %v2840_v52  ;;  %v1073_v26 = vpop.f32.mrf.mxu3 }
 0x2af   :  { %v3070_v8 = vpop.f32.mrf.mxu0 }
 0x2b0   :  { %v1074_v44 = vadd.f32 %v1073_v26, %v905_v13  ;;  %v3072_v47 = vpack.c.bf16 %v1822_v48, %v1821_v34 }
 0x2b2   :  { %v1216_v57 = vmax.f32 %v1074_v44, 0.0  ;;  %946 = vmatmul.bf16.gmra.mxu2 %v3366_v28  ;;  %1578 = vmatmul.bf16.gmra.mxu0 %v3367_v2  ;;  %v3374_v28 = vld [vmem:[#allocation28_spill] sm:$0xff] }
 0x2b3   :  { %1906 = vmatpush.bf16.xpose.msra.mxu2 %v2981_v19  ;;  %v1693_v37 = vpop.f32.mrf.mxu1  ;;  %1115 = vmatmul.bf16.gmra.mxu3 %v3368_v51 }
 0x2b4   :  { %v1694_v12 = vadd.f32 %v1693_v37, %v1525_v49  ;;  %v1306_v43 = vpack.c.bf16 %v1216_v57, %v1214_v60  ;;  %v3373_v60 = vld [vmem:[#allocation36_spill] sm:$0xff] }
 0x2b5   :  { %v907_v63 = vpop.f32.mrf.mxu2 }
 0x2b6   :  { %1732 = vmatmul.bf16.gmra.mxu1 %v1306_v43  ;;  %v1076_v45 = vpop.f32.mrf.mxu3  ;;  %v908_v15 = vadd.f32 %v907_v63, %v2840_v52  ;;  %v1823_v5 = vmax.f32 %v1694_v12, 0.0  ;;  %v1537_v63 = vadd.f32 %v2920_v38, %v3063_v50  ;;  %v3376_v50 = vld [vmem:[#allocation37_spill] sm:$0xff] }
 0x2b7   :  { %v3080_v35 = vpop.f32.mrf.mxu0 }
 0x2b8   :  { %v1077_v16 = vadd.f32 %v1076_v45, %v908_v15 }
 0x2ba   :  { %v1218_v40 = vmax.f32 %v1077_v16, 0.0 }
 0x2bb   :  { %1907 = vmatpush.bf16.xpose.msra.mxu2 %v2966_v18  ;;  %v1695_v20 = vpop.f32.mrf.mxu1  ;;  %v3369_v18 = vld [vmem:[#allocation24_spill] sm:$0xff] }
 0x2bc   :  { %v1696_v22 = vadd.f32 %v1695_v20, %v1527_v41 }
 0x2bd   :  { %v909_v19 = vpop.f32.mrf.mxu2 }
 0x2be   :  { %v1824_v55 = vmax.f32 %v1696_v22, 0.0  ;;  %v910_v61 = vadd.f32 %v909_v19, %v2840_v52  ;;  %v1078_v14 = vpop.f32.mrf.mxu3 }
 0x2bf   :  { %v3087_v9 = vpop.f32.mrf.mxu0 }
 0x2c0   :  { %v1079_v30 = vadd.f32 %v1078_v14, %v910_v61  ;;  %v3089_v29 = vpack.c.bf16 %v1824_v55, %v1823_v5 }
 0x2c2   :  { %v1220_v23 = vmax.f32 %v1079_v30, 0.0  ;;  %951 = vmatmul.bf16.gmra.mxu2 %v3369_v18  ;;  %1583 = vmatmul.bf16.gmra.mxu0 %v3370_v21  ;;  %v3377_v18 = vld [vmem:[#allocation31_spill] sm:$0xff] }
 0x2c3   :  { %1908 = vmatpush.bf16.xpose.msra.mxu2 %v2951_v31  ;;  %v1698_v1 = vpop.f32.mrf.mxu1  ;;  %1120 = vmatmul.bf16.gmra.mxu3 %v3371_v11 }
 0x2c4   :  { %v1699_v25 = vadd.f32 %v1698_v1, %v1530_v33  ;;  %v1308_v36 = vpack.c.bf16 %v1220_v23, %v1218_v40  ;;  %v3375_v40 = vld [vmem:[#allocation30_spill] sm:$0xff] }
 0x2c5   :  { %v912_v6 = vpop.f32.mrf.mxu2 }
 0x2c6   :  { %1737 = vmatmul.bf16.gmra.mxu1 %v1308_v36  ;;  %v1081_v53 = vpop.f32.mrf.mxu3  ;;  %v913_v42 = vadd.f32 %v912_v6, %v2840_v52  ;;  %v1825_v0 = vmax.f32 %v1699_v25, 0.0 }
 0x2c7   :  { %v3097_v46 = vpop.f32.mrf.mxu0 }
 0x2c8   :  { %v1082_v3 = vadd.f32 %v1081_v53, %v913_v42 }
 0x2ca   :  { %v1222_v44 = vmax.f32 %v1082_v3, 0.0 }
 0x2cb   :  { %1909 = vmatpush.bf16.xpose.msra.mxu2 %v2936_v17  ;;  %v1700_v39 = vpop.f32.mrf.mxu1  ;;  %v3372_v17 = vld [vmem:[#allocation27_spill] sm:$0xff] }
 0x2cc   :  { %v1701_v32 = vadd.f32 %v1700_v39, %v1532_v27 }
 0x2cd   :  { %v914_v31 = vpop.f32.mrf.mxu2 }
 0x2ce   :  { %v1826_v59 = vmax.f32 %v1701_v32, 0.0  ;;  %v915_v34 = vadd.f32 %v914_v31, %v2840_v52  ;;  %v1083_v4 = vpop.f32.mrf.mxu3 }
 0x2cf   :  { %v3104_v48 = vpop.f32.mrf.mxu0 }
 0x2d0   :  { %v1084_v13 = vadd.f32 %v1083_v4, %v915_v34  ;;  %v3106_v26 = vpack.c.bf16 %v1826_v59, %v1825_v0  ;;  %v3378_v59 = vld [vmem:[#allocation33_spill] sm:$0xff]  ;;  %v3379_v34 = vld [vmem:[#allocation38_spill] sm:$0xff] }
 0x2d2   :  { %v1224_v49 = vmax.f32 %v1084_v13, 0.0  ;;  %956 = vmatmul.bf16.gmra.mxu2 %v3372_v17  ;;  %1588 = vmatmul.bf16.gmra.mxu0 %v3373_v60  ;;  %v3380_v13 = vld [vmem:[#allocation34_spill] sm:$0xff] }
 0x2d3   :  { %v1703_v57 = vpop.f32.mrf.mxu1  ;;  %1125 = vmatmul.bf16.gmra.mxu3 %v3374_v28 }
 0x2d4   :  { %v1704_v2 = vadd.f32 %v1703_v57, %v1535_v10  ;;  %v1310_v37 = vpack.c.bf16 %v1224_v49, %v1222_v44 }
 0x2d5   :  { %v917_v51 = vpop.f32.mrf.mxu2 }
 0x2d6   :  { %1742 = vmatmul.bf16.gmra.mxu1 %v1310_v37  ;;  %v1086_v12 = vpop.f32.mrf.mxu3  ;;  %v918_v56 = vadd.f32 %v917_v51, %v2840_v52  ;;  %v1827_v20 = vmax.f32 %v1704_v2, 0.0 }
 0x2d7   :  { %v1551_v43 = vpop.f32.mrf.mxu0 }
 0x2d8   :  { %v1087_v22 = vadd.f32 %v1086_v12, %v918_v56 }
 0x2da   :  { %v1226_v30 = vmax.f32 %v1087_v22, 0.0 }
 0x2db   :  { %v1705_v45 = vpop.f32.mrf.mxu1 }
 0x2dc   :  { %v1706_v41 = vadd.f32 %v1705_v45, %v1537_v63 }
 0x2dd   :  { %v919_v15 = vpop.f32.mrf.mxu2 }
 0x2de   :  { %v1828_v19 = vmax.f32 %v1706_v41, 0.0  ;;  %v920_v5 = vadd.f32 %v919_v15, %v2840_v52  ;;  %v1088_v16 = vpop.f32.mrf.mxu3  ;;  %v3381_v41 = vld [vmem:[#allocation39_spill] sm:$0xff] }
 0x2df   :  { %v3117_v55 = vpop.f32.mrf.mxu0 }
 0x2e0   :  { %v1089_v61 = vadd.f32 %v1088_v16, %v920_v5  ;;  %v3119_v14 = vpack.c.bf16 %v1828_v19, %v1827_v20  ;;  %v1550_v16 = vadd.f32 %v2920_v38, %v3104_v48  ;;  %v1545_v48 = vadd.f32 %v2920_v38, %v3087_v9 }
 0x2e1   :  { %v1542_v9 = vadd.f32 %v2920_v38, %v3080_v35 }
 0x2e2   :  { %v1228_v33 = vmax.f32 %v1089_v61, 0.0  ;;  %961 = vmatmul.bf16.gmra.mxu2 %v3375_v40  ;;  %1593 = vmatmul.bf16.gmra.mxu0 %v3376_v50  ;;  %v1552_v61 = vadd.f32 %v2920_v38, %v1551_v43 }
 0x2e3   :  { %v3123_v23 = vpop.f32.mrf.mxu1  ;;  %1130 = vmatmul.bf16.gmra.mxu3 %v3377_v18  ;;  %v1547_v18 = vadd.f32 %v2920_v38, %v3097_v46 }
 0x2e4   :  { %v1312_v21 = vpack.c.bf16 %v1228_v33, %v1226_v30 }
 0x2e5   :  { %v922_v1 = vpop.f32.mrf.mxu2 }
 0x2e6   :  { %1747 = vmatmul.bf16.gmra.mxu1 %v1312_v21  ;;  %v1091_v11 = vpop.f32.mrf.mxu3  ;;  %v923_v36 = vadd.f32 %v922_v1, %v2840_v52 }
 0x2e7   :  { %v3126_v25 = vpop.f32.mrf.mxu0 }
 0x2e8   :  { %v1092_v27 = vadd.f32 %v1091_v11, %v923_v36 }
 0x2ea   :  { %v1230_v0 = vmax.f32 %v1092_v27, 0.0 }
 0x2eb   :  { %v3129_v6 = vpop.f32.mrf.mxu1 }
 0x2ed   :  { %v924_v53 = vpop.f32.mrf.mxu2 }
 0x2ee   :  { %v925_v42 = vadd.f32 %v924_v53, %v2840_v52  ;;  %v1093_v39 = vpop.f32.mrf.mxu3 }
 0x2ef   :  { %v3132_v32 = vpop.f32.mrf.mxu0 }
 0x2f0   :  { %v1094_v31 = vadd.f32 %v1093_v39, %v925_v42 }
 0x2f2   :  { %v1232_v3 = vmax.f32 %v1094_v31, 0.0  ;;  %966 = vmatmul.bf16.gmra.mxu2 %v3378_v59  ;;  %1598 = vmatmul.bf16.gmra.mxu0 %v3379_v34  ;;  %v3382_v34 = vld [vmem:[#allocation40_spill] sm:$0xff] }
 0x2f3   :  { %v1713_v4 = vpop.f32.mrf.mxu1  ;;  %1135 = vmatmul.bf16.gmra.mxu3 %v3380_v13 }
 0x2f4   :  { %v1314_v10 = vpack.c.bf16 %v1232_v3, %v1230_v0  ;;  %v1555_v0 = vadd.f32 %v2920_v38, %v3117_v55  ;;  %v1714_v3 = vadd.f32 %v1713_v4, %v1545_v48  ;;  %v1540_v55 = vadd.f32 %v2920_v38, %v3070_v8 }
 0x2f5   :  { %v927_v44 = vpop.f32.mrf.mxu2 }
 0x2f6   :  { %1752 = vmatmul.bf16.gmra.mxu1 %v1314_v10  ;;  %v1096_v49 = vpop.f32.mrf.mxu3  ;;  %v928_v60 = vadd.f32 %v927_v44, %v2840_v52 }
 0x2f7   :  { %v3137_v17 = vpop.f32.mrf.mxu0 }
 0x2f8   :  { %v1097_v2 = vadd.f32 %v1096_v49, %v928_v60 }
 0x2fa   :  { %v1234_v56 = vmax.f32 %v1097_v2, 0.0  ;;  %v1711_v2 = vadd.f32 %v3129_v6, %v1542_v9 }
 0x2fb   :  { %v1715_v57 = vpop.f32.mrf.mxu1 }
 0x2fc   :  { %v1716_v43 = vadd.f32 %v1715_v57, %v1547_v18  ;;  %v1831_v57 = vmax.f32 %v1714_v3, 0.0 }
 0x2fd   :  { %v929_v28 = vpop.f32.mrf.mxu2 }
 0x2fe   :  { %v930_v37 = vadd.f32 %v929_v28, %v2840_v52  ;;  %v1098_v51 = vpop.f32.mrf.mxu3  ;;  %v1832_v10 = vmax.f32 %v1716_v43, 0.0 }
 0x2ff   :  { %v3141_v12 = vpop.f32.mrf.mxu0 }
 0x300   :  { %v1099_v63 = vadd.f32 %v1098_v51, %v930_v37  ;;  %v1881_v37 = vpack.c.bf16 %v1832_v10, %v1831_v57  ;;  %v1709_v51 = vadd.f32 %v3123_v23, %v1540_v55 }
 0x302   :  { %v1236_v45 = vmax.f32 %v1099_v63, 0.0  ;;  %1603 = vmatmul.bf16.gmra.mxu0 %v3381_v41  ;;  %v1557_v63 = vadd.f32 %v2920_v38, %v3126_v25  ;;  %v1560_v25 = vadd.f32 %v2920_v38, %v3132_v32 }
 0x303   :  { %v1718_v15 = vpop.f32.mrf.mxu1 }
 0x304   :  { %v1316_v20 = vpack.c.bf16 %v1236_v45, %v1234_v56  ;;  %v1719_v30 = vadd.f32 %v1718_v15, %v1550_v16  ;;  %v1830_v45 = vmax.f32 %v1711_v2, 0.0  ;;  %v1829_v15 = vmax.f32 %v1709_v51, 0.0 }
 0x305   :  { %v932_v22 = vpop.f32.mrf.mxu2 }
 0x306   :  { %1757 = vmatmul.bf16.gmra.mxu1 %v1316_v20  ;;  %v1101_v19 = vpop.f32.mrf.mxu3  ;;  %v933_v33 = vadd.f32 %v932_v22, %v2840_v52  ;;  %v1833_v1 = vmax.f32 %v1719_v30, 0.0  ;;  %v1880_v30 = vpack.c.bf16 %v1830_v45, %v1829_v15 }
 0x307   :  { %v3144_v5 = vpop.f32.mrf.mxu0 }
 0x308   :  { %v1102_v11 = vadd.f32 %v1101_v19, %v933_v33 }
 0x30a   :  { %v1238_v46 = vmax.f32 %v1102_v11, 0.0 }
 0x30b   :  { %v1720_v40 = vpop.f32.mrf.mxu1 }
 0x30c   :  { %v1721_v50 = vadd.f32 %v1720_v40, %v1552_v61 }
 0x30d   :  { %v934_v21 = vpop.f32.mrf.mxu2 }
 0x30e   :  { %v1834_v36 = vmax.f32 %v1721_v50, 0.0  ;;  %v935_v53 = vadd.f32 %v934_v21, %v2840_v52  ;;  %v1103_v27 = vpop.f32.mrf.mxu3 }
 0x30f   :  { %v3153_v42 = vpop.f32.mrf.mxu0 }
 0x310   :  { %v1882_v39 = vpack.c.bf16 %v1834_v36, %v1833_v1  ;;  %v1104_v31 = vadd.f32 %v1103_v27, %v935_v53  ;;  %v1562_v53 = vadd.f32 %v2920_v38, %v3137_v17  ;;  %v1565_v17 = vadd.f32 %v2920_v38, %v3141_v12 }
 0x312   :  { %v1240_v59 = vmax.f32 %v1104_v31, 0.0  ;;  %1608 = vmatmul.bf16.gmra.mxu0 %v3382_v34  ;;  %1915 = vmatpush.bf16.xpose.msra.mxu3 %v1882_v39 }
 0x313   :  { %v1723_v13 = vpop.f32.mrf.mxu1 }
 0x314   :  { %v1318_v44 = vpack.c.bf16 %v1240_v59, %v1238_v46  ;;  %v1724_v49 = vadd.f32 %v1723_v13, %v1555_v0 }
 0x315   :  { %v937_v60 = vpop.f32.mrf.mxu2 }
 0x316   :  { %1762 = vmatmul.bf16.gmra.mxu1 %v1318_v44  ;;  %v1106_v28 = vpop.f32.mrf.mxu3  ;;  %v938_v56 = vadd.f32 %v937_v60, %v2840_v52  ;;  %v1835_v22 = vmax.f32 %v1724_v49, 0.0 }
 0x317   :  { %v3164_v4 = vpop.f32.mrf.mxu0 }
 0x318   :  { %v1107_v8 = vadd.f32 %v1106_v28, %v938_v56  ;;  %v1567_v28 = vadd.f32 %v2920_v38, %v3144_v5  ;;  %v1570_v5 = vadd.f32 %v2920_v38, %v3153_v42 }
 0x31a   :  { %1916 = vmatpush.bf16.xpose.msra.mxu3 %v1881_v37  ;;  %v1242_v40 = vmax.f32 %v1107_v8, 0.0 }
 0x31b   :  { %v1725_v35 = vpop.f32.mrf.mxu1 }
 0x31c   :  { %v1726_v41 = vadd.f32 %v1725_v35, %v1557_v63 }
 0x31d   :  { %v939_v20 = vpop.f32.mrf.mxu2 }
 0x31e   :  { %v1836_v19 = vmax.f32 %v1726_v41, 0.0  ;;  %v940_v16 = vadd.f32 %v939_v20, %v2840_v52  ;;  %v1108_v6 = vpop.f32.mrf.mxu3 }
 0x31f   :  { %v3174_v33 = vpop.f32.mrf.mxu0 }
 0x320   :  { %v1109_v61 = vadd.f32 %v1108_v6, %v940_v16  ;;  %v3172_v23 = vpack.c.bf16 %v1836_v19, %v1835_v22 }
 0x322   :  { %v1244_v50 = vmax.f32 %v1109_v61, 0.0  ;;  %1613 = vmatmul.bf16.gmra.mxu0 %v2799_v24  ;;  %1917 = vmatpush.bf16.xpose.msra.mxu3 %v1880_v30  ;;  %v3212_v61 = vld [vmem:[%s3304_s4] ss:$0 sm:$0xff] }
 0x323   :  { %v1728_v18 = vpop.f32.mrf.mxu1  ;;  %v1572_v38 = vadd.f32 %v3212_v61, %v3164_v4 }
 0x324   :  { %v1320_v21 = vpack.c.bf16 %v1244_v50, %v1242_v40  ;;  %v1729_v1 = vadd.f32 %v1728_v18, %v1560_v25 }
 0x325   :  { %v942_v11 = vpop.f32.mrf.mxu2 }
 0x326   :  { %1767 = vmatmul.bf16.gmra.mxu1 %v1320_v21  ;;  %v1111_v36 = vpop.f32.mrf.mxu3  ;;  %v943_v27 = vadd.f32 %v942_v11, %v2840_v52  ;;  %v1837_v24 = vmax.f32 %v1729_v1, 0.0 }
 0x327   :  { %v3183_v48 = vpop.f32.mrf.mxu0 }
 0x328   :  { %v1112_v31 = vadd.f32 %v1111_v36, %v943_v27  ;;  %v1575_v36 = vadd.f32 %v3212_v61, %v3174_v33 }
 0x32a   :  { %1918 = vmatpush.bf16.xpose.msra.mxu3 %v3119_v14  ;;  %v1246_v13 = vmax.f32 %v1112_v31, 0.0  ;;  %v1577_v31 = vadd.f32 %v3212_v61, %v3183_v48 }
 0x32b   :  { %v1730_v32 = vpop.f32.mrf.mxu1 }
 0x32c   :  { %v1731_v43 = vadd.f32 %v1730_v32, %v1562_v53 }
 0x32d   :  { %v944_v39 = vpop.f32.mrf.mxu2 }
 0x32e   :  { %v1838_v0 = vmax.f32 %v1731_v43, 0.0  ;;  %v945_v3 = vadd.f32 %v944_v39, %v2840_v52  ;;  %v1113_v46 = vpop.f32.mrf.mxu3 }
 0x32f   :  { %v3192_v60 = vpop.f32.mrf.mxu0 }
 0x330   :  { %v1114_v59 = vadd.f32 %v1113_v46, %v945_v3  ;;  %v3186_v34 = vpack.c.bf16 %v1838_v0, %v1837_v24 }
 0x332   :  { %v1248_v10 = vmax.f32 %v1114_v59, 0.0  ;;  %1618 = vmatmul.bf16.gmra.mxu0 %v2813_v7  ;;  %1919 = vmatpush.bf16.xpose.msra.mxu3 %v3106_v26 }
 0x333   :  { %v1733_v14 = vpop.f32.mrf.mxu1 }
 0x334   :  { %v1322_v44 = vpack.c.bf16 %v1248_v10, %v1246_v13  ;;  %v1734_v49 = vadd.f32 %v1733_v14, %v1565_v17 }
 0x335   :  { %v947_v9 = vpop.f32.mrf.mxu2 }
 0x336   :  { %1772 = vmatmul.bf16.gmra.mxu1 %v1322_v44  ;;  %v1116_v57 = vpop.f32.mrf.mxu3  ;;  %v948_v55 = vadd.f32 %v947_v9, %v2840_v52  ;;  %v1839_v37 = vmax.f32 %v1734_v49, 0.0 }
 0x337   :  { %v3199_v35 = vpop.f32.mrf.mxu0 }
 0x338   :  { %v1117_v26 = vadd.f32 %v1116_v57, %v948_v55 }
 0x33a   :  { %1920 = vmatpush.bf16.xpose.msra.mxu3 %v3089_v29  ;;  %v1250_v15 = vmax.f32 %v1117_v26, 0.0 }
 0x33b   :  { %v1735_v12 = vpop.f32.mrf.mxu1 }
 0x33c   :  { %v1736_v2 = vadd.f32 %v1735_v12, %v1567_v28 }
 0x33d   :  { %v949_v7 = vpop.f32.mrf.mxu2 }
 0x33e   :  { %v1840_v51 = vmax.f32 %v1736_v2, 0.0  ;;  %v950_v63 = vadd.f32 %v949_v7, %v2840_v52  ;;  %v1118_v56 = vpop.f32.mrf.mxu3 }
 0x33f   :  { %v3207_v6 = vpop.f32.mrf.mxu0 }
 0x340   :  { %v1119_v45 = vadd.f32 %v1118_v56, %v950_v63  ;;  %v3201_v41 = vpack.c.bf16 %v1840_v51, %v1839_v37 }
 0x342   :  { %v1252_v20 = vmax.f32 %v1119_v45, 0.0  ;;  %1623 = vmatmul.bf16.gmra.mxu0 %v2824_v58  ;;  %1921 = vmatpush.bf16.xpose.msra.mxu3 %v3072_v47 }
 0x343   :  { %v1738_v29 = vpop.f32.mrf.mxu1 }
 0x344   :  { %v1324_v22 = vpack.c.bf16 %v1252_v20, %v1250_v15  ;;  %v1739_v8 = vadd.f32 %v1738_v29, %v1570_v5 }
 0x345   :  { %v952_v19 = vpop.f32.mrf.mxu2 }
 0x346   :  { %1777 = vmatmul.bf16.gmra.mxu1 %v1324_v22  ;;  %v1121_v16 = vpop.f32.mrf.mxu3  ;;  %v953_v58 = vadd.f32 %v952_v19, %v2840_v52  ;;  %v1841_v25 = vmax.f32 %v1739_v8, 0.0 }
 0x348   :  { %v1122_v40 = vadd.f32 %v1121_v16, %v953_v58 }
 0x34a   :  { %1922 = vmatpush.bf16.xpose.msra.mxu3 %v3056_v62  ;;  %v1254_v4 = vmax.f32 %v1122_v40, 0.0  ;;  %v1586_v62 = vpop.f32.mrf.mxu0 }
 0x34b   :  { %v1740_v47 = vpop.f32.mrf.mxu1 }
 0x34c   :  { %v1741_v42 = vadd.f32 %v1740_v47, %v1572_v38 }
 0x34d   :  { %v954_v30 = vpop.f32.mrf.mxu2 }
 0x34e   :  { %v1842_v50 = vmax.f32 %v1741_v42, 0.0  ;;  %v955_v18 = vadd.f32 %v954_v30, %v2840_v52  ;;  %v1123_v21 = vpop.f32.mrf.mxu3 }
 0x350   :  { %v1124_v1 = vadd.f32 %v1123_v21, %v955_v18  ;;  %v3219_v11 = vpack.c.bf16 %v1842_v50, %v1841_v25 }
 0x352   :  { %v1256_v53 = vmax.f32 %v1124_v1, 0.0  ;;  %1628 = vmatmul.bf16.gmra.mxu0 %v2835_v54  ;;  %v1589_v59 = vpop.f32.mrf.mxu0 }
 0x353   :  { %v1743_v27 = vpop.f32.mrf.mxu1 }
 0x354   :  { %v1326_v32 = vpack.c.bf16 %v1256_v53, %v1254_v4  ;;  %v1744_v43 = vadd.f32 %v1743_v27, %v1575_v36  ;;  %v1590_v4 = vadd.f32 %v3212_v61, %v1589_v59 }
 0x355   :  { %v957_v39 = vpop.f32.mrf.mxu2 }
 0x356   :  { %1782 = vmatmul.bf16.gmra.mxu1 %v1326_v32  ;;  %v1126_v24 = vpop.f32.mrf.mxu3  ;;  %v958_v0 = vadd.f32 %v957_v39, %v2840_v52  ;;  %v1843_v17 = vmax.f32 %v1744_v43, 0.0  ;;  %v1587_v39 = vadd.f32 %v3212_v61, %v1586_v62  ;;  %v1580_v62 = vadd.f32 %v3212_v61, %v3192_v60 }
 0x358   :  { %v1127_v13 = vadd.f32 %v1126_v24, %v958_v0  ;;  %v1585_v0 = vadd.f32 %v3212_v61, %v3207_v6 }
 0x35a   :  { %v1258_v9 = vmax.f32 %v1127_v13, 0.0  ;;  %v1591_v2 = vpop.f32.mrf.mxu0 }
 0x35b   :  { %v1745_v3 = vpop.f32.mrf.mxu1  ;;  %v1592_v53 = vadd.f32 %v3212_v61, %v1591_v2 }
 0x35c   :  { %v1746_v46 = vadd.f32 %v1745_v3, %v1577_v31 }
 0x35d   :  { %v959_v33 = vpop.f32.mrf.mxu2 }
 0x35e   :  { %v1844_v10 = vmax.f32 %v1746_v46, 0.0  ;;  %v960_v54 = vadd.f32 %v959_v33, %v2840_v52  ;;  %v1128_v14 = vpop.f32.mrf.mxu3 }
 0x360   :  { %v3228_v44 = vpack.c.bf16 %v1844_v10, %v1843_v17  ;;  %v1129_v49 = vadd.f32 %v1128_v14, %v960_v54  ;;  %v1582_v54 = vadd.f32 %v3212_v61, %v3199_v35 }
 0x362   :  { %v1260_v57 = vmax.f32 %v1129_v49, 0.0  ;;  %v1594_v5 = vpop.f32.mrf.mxu0 }
 0x363   :  { %v1748_v28 = vpop.f32.mrf.mxu1  ;;  %v1595_v33 = vadd.f32 %v3212_v61, %v1594_v5 }
 0x364   :  { %v1328_v55 = vpack.c.bf16 %v1260_v57, %v1258_v9  ;;  %v1749_v6 = vadd.f32 %v1748_v28, %v1580_v62 }
 0x365   :  { %v962_v48 = vpop.f32.mrf.mxu2 }
 0x366   :  { %1787 = vmatmul.bf16.gmra.mxu1 %v1328_v55  ;;  %v1131_v12 = vpop.f32.mrf.mxu3  ;;  %v963_v7 = vadd.f32 %v962_v48, %v2840_v52 }
 0x368   :  { %v1132_v51 = vadd.f32 %v1131_v12, %v963_v7  ;;  %v1845_v7 = vmax.f32 %v1749_v6, 0.0 }
 0x36a   :  { %v1262_v15 = vmax.f32 %v1132_v51, 0.0  ;;  %v1596_v38 = vpop.f32.mrf.mxu0 }
 0x36b   :  { %v1750_v37 = vpop.f32.mrf.mxu1  ;;  %v1597_v55 = vadd.f32 %v3212_v61, %v1596_v38 }
 0x36c   :  { %v1751_v49 = vadd.f32 %v1750_v37, %v1582_v54 }
 0x36d   :  { %v964_v26 = vpop.f32.mrf.mxu2 }
 0x36e   :  { %v965_v63 = vadd.f32 %v964_v26, %v2840_v52  ;;  %v1133_v56 = vpop.f32.mrf.mxu3  ;;  %v1846_v12 = vmax.f32 %v1751_v49, 0.0 }
 0x370   :  { %v1134_v45 = vadd.f32 %v1133_v56, %v965_v63  ;;  %v1888_v63 = vpack.c.bf16 %v1846_v12, %v1845_v7 }
 0x372   :  { %v1264_v20 = vmax.f32 %v1134_v45, 0.0  ;;  %v1599_v36 = vpop.f32.mrf.mxu0 }
 0x373   :  { %v1753_v29 = vpop.f32.mrf.mxu1  ;;  %v1600_v35 = vadd.f32 %v3212_v61, %v1599_v36 }
 0x374   :  { %v1330_v22 = vpack.c.bf16 %v1264_v20, %v1262_v15  ;;  %v1754_v17 = vadd.f32 %v1753_v29, %v1585_v0 }
 0x375   :  { %v967_v8 = vpop.f32.mrf.mxu2 }
 0x376   :  { %1792 = vmatmul.bf16.gmra.mxu1 %v1330_v22  ;;  %v1136_v19 = vpop.f32.mrf.mxu3  ;;  %v968_v16 = vadd.f32 %v967_v8, %v2840_v52  ;;  %v1847_v14 = vmax.f32 %v1754_v17, 0.0 }
 0x378   :  { %v1137_v42 = vadd.f32 %v1136_v19, %v968_v16 }
 0x37a   :  { %v1266_v50 = vmax.f32 %v1137_v42, 0.0 }
 0x37b   :  { %v1755_v58 = vpop.f32.mrf.mxu1 }
 0x37c   :  { %v1756_v3 = vadd.f32 %v1755_v58, %v1587_v39 }
 0x37d   :  { %v969_v47 = vpop.f32.mrf.mxu2 }
 0x37e   :  { %v970_v30 = vadd.f32 %v969_v47, %v2840_v52  ;;  %v1138_v25 = vpop.f32.mrf.mxu3  ;;  %v1601_v52 = vpop.f32.mrf.mxu0  ;;  %v1848_v13 = vmax.f32 %v1756_v3, 0.0 }
 0x37f   :  { %v1602_v28 = vadd.f32 %v3212_v61, %v1601_v52 }
 0x380   :  { %v1139_v40 = vadd.f32 %v1138_v25, %v970_v30  ;;  %v1889_v9 = vpack.c.bf16 %v1848_v13, %v1847_v14 }
 0x382   :  { %v1268_v18 = vmax.f32 %v1139_v40, 0.0 }
 0x383   :  { %v1758_v21 = vpop.f32.mrf.mxu1 }
 0x384   :  { %v1332_v1 = vpack.c.bf16 %v1268_v18, %v1266_v50  ;;  %v1759_v27 = vadd.f32 %v1758_v21, %v1590_v4 }
 0x386   :  { %1797 = vmatmul.bf16.gmra.mxu1 %v1332_v1  ;;  %v1849_v24 = vmax.f32 %v1759_v27, 0.0  ;;  %v1604_v57 = vpop.f32.mrf.mxu0 }
 0x387   :  { %v1605_v19 = vadd.f32 %v3212_v61, %v1604_v57 }
 0x38b   :  { %v1760_v32 = vpop.f32.mrf.mxu1 }
 0x38c   :  { %v1761_v43 = vadd.f32 %v1760_v32, %v1592_v53 }
 0x38e   :  { %v1850_v31 = vmax.f32 %v1761_v43, 0.0  ;;  %v1606_v60 = vpop.f32.mrf.mxu0 }
 0x38f   :  { %v1607_v47 = vadd.f32 %v3212_v61, %v1606_v60 }
 0x390   :  { %v1890_v46 = vpack.c.bf16 %v1850_v31, %v1849_v24 }
 0x392   :  { %1928 = vmatpush.bf16.xpose.msrb.mxu2 %v1890_v46 }
 0x393   :  { %v1763_v59 = vpop.f32.mrf.mxu1 }
 0x394   :  { %v1764_v10 = vadd.f32 %v1763_v59, %v1595_v33 }
 0x396   :  { %v1851_v26 = vmax.f32 %v1764_v10, 0.0  ;;  %v1609_v20 = vpop.f32.mrf.mxu0 }
 0x397   :  { %v1610_v18 = vadd.f32 %v3212_v61, %v1609_v20 }
 0x39a   :  { %1929 = vmatpush.bf16.xpose.msrb.mxu2 %v1889_v9 }
 0x39b   :  { %v1765_v48 = vpop.f32.mrf.mxu1 }
 0x39c   :  { %v1766_v2 = vadd.f32 %v1765_v48, %v1597_v55 }
 0x39e   :  { %v1852_v51 = vmax.f32 %v1766_v2, 0.0  ;;  %v1611_v58 = vpop.f32.mrf.mxu0 }
 0x39f   :  { %v1612_v1 = vadd.f32 %v3212_v61, %v1611_v58 }
 0x3a0   :  { %v3245_v56 = vpack.c.bf16 %v1852_v51, %v1851_v26 }
 0x3a2   :  { %1930 = vmatpush.bf16.xpose.msrb.mxu2 %v1888_v63 }
 0x3a3   :  { %v1768_v37 = vpop.f32.mrf.mxu1 }
 0x3a4   :  { %v1769_v45 = vadd.f32 %v1768_v37, %v1600_v35  ;;  %v1899_v37 = vld [vmem:[%s3305_s5] sm:$0x1] }
 0x3a5   :  { %1910 = vmatmul.bf16.vlgmr.msra.gmra.mxu2 %v1899_v37  ;;  %1923 = vmatmul.bf16.vlgmr.msra.gmra.mxu3 %v1899_v37 }
 0x3a6   :  { %v1853_v29 = vmax.f32 %v1769_v45, 0.0  ;;  %v1614_v50 = vpop.f32.mrf.mxu0 }
 0x3a7   :  { %v1615_v43 = vadd.f32 %v3212_v61, %v1614_v50 }
 0x3aa   :  { %1931 = vmatpush.bf16.xpose.msrb.mxu2 %v3228_v44 }
 0x3ab   :  { %v1770_v5 = vpop.f32.mrf.mxu1 }
 0x3ac   :  { %v1771_v15 = vadd.f32 %v1770_v5, %v1602_v28 }
 0x3ae   :  { %v1854_v22 = vmax.f32 %v1771_v15, 0.0  ;;  %v1616_v36 = vpop.f32.mrf.mxu0 }
 0x3af   :  { %v1617_v52 = vadd.f32 %v3212_v61, %v1616_v36 }
 0x3b0   :  { %v3250_v8 = vpack.c.bf16 %v1854_v22, %v1853_v29 }
 0x3b2   :  { %1932 = vmatpush.bf16.xpose.msrb.mxu2 %v3219_v11 }
 0x3b3   :  { %v1773_v16 = vpop.f32.mrf.mxu1 }
 0x3b4   :  { %v1774_v38 = vadd.f32 %v1773_v16, %v1605_v19 }
 0x3b6   :  { %v1855_v30 = vmax.f32 %v1774_v38, 0.0  ;;  %v1619_v31 = vpop.f32.mrf.mxu0 }
 0x3b7   :  { %v1620_v15 = vadd.f32 %v3212_v61, %v1619_v31 }
 0x3ba   :  { %1933 = vmatpush.bf16.xpose.msrb.mxu2 %v3201_v41 }
 0x3bb   :  { %v1775_v42 = vpop.f32.mrf.mxu1 }
 0x3bc   :  { %v1776_v44 = vadd.f32 %v1775_v42, %v1607_v47 }
 0x3be   :  { %v1856_v25 = vmax.f32 %v1776_v44, 0.0  ;;  %v1621_v33 = vpop.f32.mrf.mxu0 }
 0x3bf   :  { %v1622_v28 = vadd.f32 %v3212_v61, %v1621_v33 }
 0x3c0   :  { %v3256_v40 = vpack.c.bf16 %v1856_v25, %v1855_v30  ;;  %v1901_v25 = vstv %s3306_s6 }
 0x3c2   :  { %1934 = vmatpush.bf16.xpose.msrb.mxu2 %v3186_v34 }
 0x3c3   :  { %v1778_v21 = vpop.f32.mrf.mxu1 }
 0x3c4   :  { %v1779_v11 = vadd.f32 %v1778_v21, %v1610_v18 }
 0x3c6   :  { %v1857_v53 = vmax.f32 %v1779_v11, 0.0  ;;  %v1624_v59 = vpop.f32.mrf.mxu0 }
 0x3c7   :  { %v1625_v51 = vadd.f32 %v3212_v61, %v1624_v59 }
 0x3ca   :  { %1935 = vmatpush.bf16.xpose.msrb.mxu2 %v3172_v23 }
 0x3cb   :  { %v1780_v4 = vpop.f32.mrf.mxu1 }
 0x3cc   :  { %v1781_v41 = vadd.f32 %v1780_v4, %v1612_v1 }
 0x3ce   :  { %v1858_v27 = vmax.f32 %v1781_v41, 0.0  ;;  %v1626_v10 = vpop.f32.mrf.mxu0 }
 0x3cf   :  { %v1627_v2 = vadd.f32 %v3212_v61, %v1626_v10 }
 0x3d0   :  { %v1894_v32 = vpack.c.bf16 %v1858_v27, %v1857_v53 }
 0x3d1   :  { %1936 = vmatmul.bf16.vlgmr.msrb.gmra.mxu2 %v1899_v37 }
 0x3d3   :  { %v1783_v39 = vpop.f32.mrf.mxu1 }
 0x3d4   :  { %v1784_v24 = vadd.f32 %v1783_v39, %v1615_v43 }
 0x3d6   :  { %v1859_v3 = vmax.f32 %v1784_v24, 0.0  ;;  %v1629_v62 = vpop.f32.mrf.mxu0 }
 0x3d7   :  { %v1630_v57 = vadd.f32 %v3212_v61, %v1629_v62 }
 0x3db   :  { %v1785_v34 = vpop.f32.mrf.mxu1 }
 0x3dc   :  { %v1786_v0 = vadd.f32 %v1785_v34, %v1617_v52 }
 0x3de   :  { %v1860_v46 = vmax.f32 %v1786_v0, 0.0  ;;  %v1631_v9 = vpop.f32.mrf.mxu0 }
 0x3df   :  { %v1632_v6 = vadd.f32 %v3212_v61, %v1631_v9 }
 0x3e0   :  { %v1895_v17 = vpack.c.bf16 %v1860_v46, %v1859_v3 }
 0x3e3   :  { %v1788_v23 = vpop.f32.mrf.mxu1 }
 0x3e4   :  { %v1789_v22 = vadd.f32 %v1788_v23, %v1620_v15 }
 0x3e6   :  { %v1861_v16 = vmax.f32 %v1789_v22, 0.0 }
 0x3eb   :  { %v1790_v13 = vpop.f32.mrf.mxu1 }
 0x3ec   :  { %v1791_v20 = vadd.f32 %v1790_v13, %v1622_v28 }
 0x3ee   :  { %v1862_v19 = vmax.f32 %v1791_v20, 0.0 }
 0x3f0   :  { %v1896_v38 = vpack.c.bf16 %v1862_v19, %v1861_v16 }
 0x3f3   :  { %v1793_v54 = vpop.f32.mrf.mxu1 }
 0x3f4   :  { %v1794_v60 = vadd.f32 %v1793_v54, %v1625_v51 }
 0x3f6   :  { %v1863_v5 = vmax.f32 %v1794_v60, 0.0 }
 0x3fb   :  { %v1795_v14 = vpop.f32.mrf.mxu1 }
 0x3fc   :  { %v1796_v63 = vadd.f32 %v1795_v14, %v1627_v2 }
 0x3fe   :  { %v1864_v45 = vmax.f32 %v1796_v63, 0.0 }
 0x400   :  { %v1897_v29 = vpack.c.bf16 %v1864_v45, %v1863_v5 }
 0x403   :  { %v1798_v49 = vpop.f32.mrf.mxu1 }
 0x404   :  { %v1799_v55 = vadd.f32 %v1798_v49, %v1630_v57 }
 0x406   :  { %v1865_v7 = vmax.f32 %v1799_v55, 0.0 }
 0x40b   :  { %v1800_v48 = vpop.f32.mrf.mxu1 }
 0x40c   :  { %v1801_v12 = vadd.f32 %v1800_v48, %v1632_v6 }
 0x40e   :  { %v1866_v26 = vmax.f32 %v1801_v12, 0.0 }
 0x410   :  { %v1898_v35 = vpack.c.bf16 %v1866_v26, %v1865_v7 }
 0x412   :  { %1941 = vmatpush.bf16.xpose.msrb.mxu3 %v1898_v35 }
 0x41a   :  { %1942 = vmatpush.bf16.xpose.msrb.mxu3 %v1897_v29 }
 0x422   :  { %1943 = vmatpush.bf16.xpose.msrb.mxu3 %v1896_v38 }
 0x428   :  { %v1911_v58 = vpop.f32.mrf.mxu2  ;;  %v1924_v61 = vpop.f32.mrf.mxu3 }
 0x429   :  { %v1925_v50 = vadd.f32 %v1924_v61, %v1901_v25  ;;  %v1912_v21 = vadd.f32 %v1911_v58, %v1901_v25  ;;  %v2044_v61 = vlaneseq }
 0x42a   :  { %1944 = vmatpush.bf16.xpose.msrb.mxu3 %v1895_v17 }
 0x42b   :  { %v2260_v11 = vmul.f32 -1.442695, %v1925_v50  ;;  %v2259_v1 = vmul.f32 -1.442695, %v1912_v21 }
 0x42d   :  { %2338 = vpow2.f32 %v2260_v11 }
 0x430   :  { %v1913_v47 = vpop.f32.mrf.mxu2  ;;  %v1926_v42 = vpop.f32.mrf.mxu3 }
 0x432   :  { %1945 = vmatpush.bf16.xpose.msrb.mxu3 %v1894_v32 }
 0x43a   :  { %1946 = vmatpush.bf16.xpose.msrb.mxu3 %v3256_v40 }
 0x442   :  { %1947 = vmatpush.bf16.xpose.msrb.mxu3 %v3250_v8 }
 0x44a   :  { %1948 = vmatpush.bf16.xpose.msrb.mxu3 %v3245_v56  ;;  %v2339_v56 = vpop.eup %2338 }
 0x44b   :  { %v1967_v36 = vadd.f32 1.0, %v2339_v56 }
 0x44d   :  { %vm1990_vm0 = vweird.f32 %v1967_v36  ;;  %v1994_v54 = vand.u32 2147483647, %v1967_v36  ;;  %v1996_v14 = vand.u32 2147483648, %v1967_v36 }
 0x44f   :  { %v1997_v26 = vor.u32 1.1754944e-38, %v1996_v14  ;;  %vm1995_vm8 = vcmp.eq.f32.partialorder %v1994_v54, 8.507059e+37 }
 0x451   :  { %1949 = vmatmul.bf16.vlgmr.msrb.gmra.mxu3 %v1899_v37 }
 0x454   :  { %v1937_v44 = vpop.f32.mrf.mxu2 }
 0x455   :  { %v1938_v18 = vadd.f32 %v1937_v44, %v1901_v25 }
 0x457   :  { %v2261_v40 = vmul.f32 -1.442695, %v1938_v18 }
 0x459   :  { %2340 = vpow2.f32 %v2261_v40 }
 0x45a   :  { %2342 = vpow2.f32 %v2259_v1 }
 0x45b   :  { %2344 = vrcp.f32 %v1967_v36 }
 0x45c   :  { %v1939_v30 = vpop.f32.mrf.mxu2 }
 0x45f   :  { %v2341_v8 = vpop.eup %2340 }
 0x460   :  { %v2343_v4 = vpop.eup %2342  ;;  %v1968_v41 = vadd.f32 1.0, %v2341_v8 }
 0x461   :  { %v1966_v53 = vadd.f32 1.0, %v2343_v4  ;;  %v2345_v39 = vpop.eup %2344 }
 0x462   :  { %2346 = vrcp.f32 %v1968_v41  ;;  %v1986_v31 = vmul.f32 %v2345_v39, %v1967_v36  ;;  %vm1991_vm1 = vweird.f32 %v2345_v39  ;;  %vm2005_vm2 = vweird.f32 %v1968_v41 }
 0x463   :  { %2348 = vrcp.f32 %v1966_v53  ;;  %vm3279_vm4 = vmor %vm1990_vm0, %vm1991_vm1  ;;  %v2009_v6 = vand.u32 2147483647, %v1968_v41  ;;  %v2011_v55 = vand.u32 2147483648, %v1968_v41  ;;  %vm1975_vm5 = vweird.f32 %v1966_v53 }
 0x464   :  { %v1987_v33 = vsub.f32 1.0, %v1986_v31  ;;  %v1979_v2 = vand.u32 2147483647, %v1966_v53  ;;  %v1981_v7 = vand.u32 2147483648, %v1966_v53  ;;  %vm2037_vm0 = vcmask 1040384  }
 0x465   :  { %vm2010_vm10 = vcmp.eq.f32.partialorder %v2009_v6, 8.507059e+37  ;;  %v2012_v45 = vor.u32 1.1754944e-38, %v2011_v55  ;;  %vm2039_vm1 = vcmask 1042434  }
 0x466   :  { %v1988_v13 = vmul.f32 %v2345_v39, %v1987_v33  ;;  %v1982_v29 = vor.u32 1.1754944e-38, %v1981_v7  ;;  %vm1980_vm12 = vcmp.eq.f32.partialorder %v1979_v2, 8.507059e+37 }
 0x468   :  { %v2347_v24 = vpop.eup %2346  ;;  %v1989_v49 = vadd.f32 %v2345_v39, %v1988_v13 }
 0x469   :  { %v2349_v52 = vpop.eup %2348  ;;  %v2001_v0 = vmul.f32 %v2347_v24, %v1968_v41  ;;  %vm2006_vm3 = vweird.f32 %v2347_v24 }
 0x46a   :  { %v1971_v46 = vmul.f32 %v2349_v52, %v1966_v53  ;;  %vm1976_vm6 = vweird.f32 %v2349_v52  ;;  %vm3283_vm7 = vmor %vm2005_vm2, %vm2006_vm3  ;;  %v1993_v35 = vsel %vm3279_vm4, %v2345_v39, %v1989_v49  ;;  %vm2041_vm2 = vcmask 1041408  }
 0x46b   :  { %v2002_v23 = vsub.f32 1.0, %v2001_v0  ;;  %vm3289_vm9 = vmor %vm1975_vm5, %vm1976_vm6  ;;  %v1998_v22 = vsel %vm1995_vm8, %v1997_v26, %v1993_v35  ;;  %vm2046_vm3 = vcmp.lt.s32.totalorder %v2044_v61, 512 }
 0x46c   :  { %v1972_v59 = vsub.f32 1.0, %v1971_v46  ;;  %v2034_v47 = vrot.slane %v1998_v22, 7 }
 0x46d   :  { %v2003_v10 = vmul.f32 %v2347_v24, %v2002_v23 }
 0x46e   :  { %v1973_v62 = vmul.f32 %v2349_v52, %v1972_v59 }
 0x46f   :  { %v2004_v48 = vadd.f32 %v2347_v24, %v2003_v10 }
 0x470   :  { %v1974_v63 = vadd.f32 %v2349_v52, %v1973_v62 }
 0x471   :  { %v2008_v5 = vsel %vm3283_vm7, %v2347_v24, %v2004_v48 }
 0x472   :  { %v1978_v19 = vsel %vm3289_vm9, %v2349_v52, %v1974_v63  ;;  %v2013_v38 = vsel %vm2010_vm10, %v2012_v45, %v2008_v5 }
 0x473   :  { %v1983_v44 = vsel %vm1980_vm12, %v1982_v29, %v1978_v19 }
 0x474   :  { %v2038_v18 = vsel %vm2037_vm0, %v1983_v44, %v2034_v47 }
 0x4d4   :  { %v1950_v27 = vpop.f32.mrf.mxu3 }
 0x4d5   :  { %v1951_v32 = vadd.f32 %v1950_v27, %v1901_v25  ;;  %v2035_v25 = vrot.slane %v2013_v38, 6 }
 0x4d7   :  { %v2262_v43 = vmul.f32 -1.442695, %v1951_v32 }
 0x4d9   :  { %2350 = vpow2.f32 %v2262_v43 }
 0x4dc   :  { %v1952_v34 = vpop.f32.mrf.mxu3 }
 0x4df   :  { %v2351_v3 = vpop.eup %2350 }
 0x4e0   :  { %v1969_v17 = vadd.f32 1.0, %v2351_v3 }
 0x4e2   :  { %2352 = vrcp.f32 %v1969_v17  ;;  %v2026_v28 = vand.u32 2147483648, %v1969_v17  ;;  %v2024_v20 = vand.u32 2147483647, %v1969_v17  ;;  %vm2020_vm13 = vweird.f32 %v1969_v17 }
 0x4e4   :  { %v2027_v58 = vor.u32 1.1754944e-38, %v2026_v28  ;;  %vm2025_vm15 = vcmp.eq.f32.partialorder %v2024_v20, 8.507059e+37 }
 0x4e8   :  { %v2353_v9 = vpop.eup %2352 }
 0x4e9   :  { %v2016_v12 = vmul.f32 %v2353_v9, %v1969_v17  ;;  %vm2021_vm11 = vweird.f32 %v2353_v9 }
 0x4ea   :  { %vm2022_vm14 = vmor %vm2020_vm13, %vm2021_vm11 }
 0x4eb   :  { %v2017_v60 = vsub.f32 1.0, %v2016_v12 }
 0x4ed   :  { %v2018_v15 = vmul.f32 %v2353_v9, %v2017_v60 }
 0x4ef   :  { %v2019_v16 = vadd.f32 %v2353_v9, %v2018_v15 }
 0x4f1   :  { %v2023_v42 = vsel %vm2022_vm14, %v2353_v9, %v2019_v16 }
 0x4f2   :  { %v2028_v30 = vsel %vm2025_vm15, %v2027_v58, %v2023_v42 }
 0x4f3   :  { %v2036_v50 = vrot.slane %v2028_v30, 5 }
 0x4f5   :  { %v2040_v21 = vsel %vm2039_vm1, %v2035_v25, %v2036_v50 }
 0x4f6   :  { %v2042_v11 = vsel %vm2041_vm2, %v2038_v18, %v2040_v21 }
 0x4f7   :  { %2048 = vst.msk [vmem:[#allocation9] sm:$0xf] %vm2046_vm3, %v2042_v11 }
 0x4f8   :  { %2052 = vsyncadd [#allocation5], 16  ;;  %s2056_s29 = sshll.u32 %s3307_s7, 4  ;;  %s2467_s30 = smov [#allocation9]   ;;  %s2057_s29 = int_to_ptr.hbm [resolvable:$true] %s2056_s29 }
 0x4f9   :  { %s2054_s8 = sshll.u32 %s2467_s30, 4  ;;  %s2055_s8 = int_to_ptr.vmem [resolvable:$true] %s2054_s8 }
 0x4fa   :  { %2059 = dma.vmem_to_hbm [thread:$0]  %s2055_s8, 48, %s2057_s29, [#allocation5]  }
 0x4fb   :  { %2456 = dma.done.wait [#allocation5], 64  }
 0x4fc   :  { %2457 = vsyncadd [#allocation5], 4294967232 }
 0x4fd   :  { %2064 = vsyncpa [#allocation4], 1 }
 0x4fe   :  { %2065 = vsyncpa [#allocation7], 1 }
 0x4ff   :  { %2066 = vsyncpa [#allocation5], 1 }

</bundles_post_ra>
